<compile_context>
chip_gen: v7x
topology: tpu7x:2x2x1
jax: 0.10.0
libtpu: 0.0.40
codegen_flags: <defaults>
</compile_context>

<pallas_src>
import functools

import jax
import jax.numpy as jnp
from jax import lax
from jax.experimental import pallas as pl
from jax.experimental.pallas import tpu as pltpu


def _rdown(x, m):
    return (x // m) * m


def _rup(x, m):
    return ((x + m - 1) // m) * m


def _band_block(r0, r1, c0, c1, r):
    """Block [r0:r1, c0:c1] of the symmetric band matrix A[i, j] = (|i - j| <= r)."""
    ri = lax.broadcasted_iota(jnp.int32, (r1 - r0, c1 - c0), 0) + r0
    ci = lax.broadcasted_iota(jnp.int32, (r1 - r0, c1 - c0), 1) + c0
    return jnp.where(jnp.abs(ri - ci) <= r, 1.0, 0.0).astype(jnp.float32)


def _guided_filter_kernel(invN_ref, I_ref, p_ref, o_ref, *, r, eps, blk):
    I = I_ref[...].astype(jnp.float32)          # (TB, H, W)
    p = p_ref[...].astype(jnp.float32)
    inv_N = invN_ref[...]                       # (H, W) — hoisted, broadcast over planes
    TB, H, W = I.shape

    # ---- banded pieces of A_h / A_w, built once per grid step from iota (cheap VPU work) ----
    nb_h = pl.cdiv(H, blk)
    nb_w = pl.cdiv(W, blk)

    ah_blocks, ah_ranges = [], []
    for bi in range(nb_h):
        r0, r1 = bi * blk, min((bi + 1) * blk, H)
        k0, k1 = max(0, _rdown(r0 - r, 8)), min(H, _rup(r1 + r, 8))      # sublane-aligned
        ah_ranges.append((k0, k1))
        ah_blocks.append(_band_block(r0, r1, k0, k1, r))                 # (r1-r0, k1-k0)

    aw_blocks, aw_ranges = [], []
    for bj in range(nb_w):
        c0, c1 = bj * blk, min((bj + 1) * blk, W)
        k0, k1 = max(0, _rdown(c0 - r, 128)), min(W, _rup(c1 + r, 128))  # lane-aligned
        aw_ranges.append((k0, k1))
        aw_blocks.append(_band_block(k0, k1, c0, c1, r))                 # (k1-k0, c1-c0)

    def box_stack(x):
        # x: (n, H, W) -> per-plane box *sums* (n, H, W) via block-banded MXU matmuls.
        n = x.shape[0]
        # Right multiply (x @ A_w) for ALL planes at once: planes stacked along sublanes.
        xt = x.reshape(n * H, W)
        cols = [jnp.dot(xt[:, k0:k1], blkA, preferred_element_type=jnp.float32)
                for (k0, k1), blkA in zip(aw_ranges, aw_blocks)]
        t = cols[0] if len(cols) == 1 else jnp.concatenate(cols, axis=-1)
        t = t.reshape(n, H, W)
        # Left multiply (A_h @ t_i) per plane, banded over output row blocks.
        planes = []
        for i in range(n):
            rows = [jnp.dot(blkA, t[i, k0:k1, :], preferred_element_type=jnp.float32)
                    for (k0, k1), blkA in zip(ah_ranges, ah_blocks)]
            planes.append(rows[0] if len(rows) == 1 else jnp.concatenate(rows, axis=0))
        return jnp.stack(planes, axis=0)

    # One fused pass for the four image statistics.
    stats = jnp.concatenate([I, p, I * p, I * I], axis=0)                # (4*TB, H, W)
    means = box_stack(stats) * inv_N
    mean_I, mean_p = means[0 * TB:1 * TB], means[1 * TB:2 * TB]
    mean_Ip, mean_II = means[2 * TB:3 * TB], means[3 * TB:4 * TB]

    cov_Ip = mean_Ip - mean_I * mean_p
    var_I = mean_II - mean_I * mean_I
    a = cov_Ip * pl.reciprocal(var_I + eps, approx=False)
    b = mean_p - a * mean_I

    mean_ab = box_stack(jnp.concatenate([a, b], axis=0)) * inv_N         # (2*TB, H, W)
    o_ref[...] = (mean_ab[:TB] * I + mean_ab[TB:]).astype(o_ref.dtype)


def _pick_tb(n_planes, plane_bytes, budget_bytes=24 << 20, max_tb=8):
    """Planes per grid step: fill a VMEM budget, keep >=2 grid steps when possible."""
    best = 1
    for tb in range(1, min(n_planes, max_tb) + 1):
        if n_planes % tb:
            continue
        if tb * plane_bytes * 26 > budget_bytes:       # ~26 live f32 planes per image
            continue
        if n_planes > 1 and n_planes // tb < 2:
            continue                                   # keep the parallel axis >= 2 (v7x 2 TCs)
        best = tb
    return best


def guided_filter(I, p, *, r=40, eps=1e-3, tb=None, band_blk=128):
    """I, p: [B, C, H, W] float32 in [0, 1]. Returns [B, C, H, W] float32."""
    assert I.shape == p.shape and I.ndim == 4
    B, C, H, W = I.shape
    BC = B * C
    plane_bytes = H * W * 4

    if tb is None:
        tb = _pick_tb(BC, plane_bytes)
    assert BC % tb == 0

    # N = boxsum(ones) depends only on (H, W, r): hoist 1/N out of the kernel (closed form).
    ys = jnp.arange(H, dtype=jnp.int32)
    xs = jnp.arange(W, dtype=jnp.int32)
    ny = jnp.minimum(ys + r, H - 1) - jnp.maximum(ys - r, 0) + 1
    nx = jnp.minimum(xs + r, W - 1) - jnp.maximum(xs - r, 0) + 1
    inv_N = 1.0 / (ny[:, None] * nx[None, :]).astype(jnp.float32)        # (H, W)

    I_flat = I.reshape(BC, H, W).astype(jnp.float32)
    p_flat = p.reshape(BC, H, W).astype(jnp.float32)

    # Scoped-VMEM sizing: double-buffered I/p/out pipeline + live f32 temporaries + band blocks.
    band_bytes = 4 * (H + W) * min(max(H, W), band_blk + 2 * r + 256)
    working = (3 * 2 * tb + 26 * tb) * plane_bytes + 2 * plane_bytes + band_bytes
    vmem_limit = int(min(max(2 * working, 32 << 20), 100 << 20))
    # TODO(synk): for >=1K^2 images on v7x (64 MiB VMEM), add spatial tiling with an r-pixel
    # halo instead of keeping the whole plane (and ~26 temporaries) resident per step.

    out = pl.pallas_call(
        functools.partial(_guided_filter_kernel, r=r, eps=eps, blk=band_blk),
        out_shape=jax.ShapeDtypeStruct((BC, H, W), jnp.float32),
        grid=(BC // tb,),
        in_specs=[
            pl.BlockSpec((H, W), lambda i: (0, 0)),            # inv_N (grid-invariant)
            pl.BlockSpec((tb, H, W), lambda i: (i, 0, 0)),     # I planes
            pl.BlockSpec((tb, H, W), lambda i: (i, 0, 0)),     # p planes
        ],
        out_specs=pl.BlockSpec((tb, H, W), lambda i: (i, 0, 0)),
        compiler_params=pltpu.CompilerParams(
            dimension_semantics=("parallel",),
            vmem_limit_bytes=vmem_limit,
        ),
    )(inv_N, I_flat, p_flat)

    return out.reshape(B, C, H, W)


def _guided_filter_ref(I, p, *, r, eps):
    """Pure-JAX reference (reduce_window box sums) for correctness checking."""
    K = 2 * r + 1

    def boxsum(x):
        return lax.reduce_window(
            x, 0.0, lax.add,
            window_dimensions=(1, 1, K, K),
            window_strides=(1, 1, 1, 1),
            padding=[(0, 0), (0, 0), (r, r), (r, r)])

    N = boxsum(jnp.ones_like(p))
    mean_I = boxsum(I) / N
    mean_p = boxsum(p) / N
    mean_Ip = boxsum(I * p) / N
    cov_Ip = mean_Ip - mean_I * mean_p
    mean_II = boxsum(I * I) / N
    var_I = mean_II - mean_I * mean_I
    a = cov_Ip / (var_I + eps)
    b = mean_p - a * mean_I
    mean_a = boxsum(a) / N
    mean_b = boxsum(b) / N
    return mean_a * I + mean_b


if __name__ == "__main__":
    # Small example consistent with the module: B=2, C=4, H=W=16.
    # Use r=4 (module default r=40 assumes large images); eps keeps the default 1e-3.
    B, C, H, W = 2, 4, 16, 16
    r, eps = 4, 1e-3

    key = jax.random.PRNGKey(0)
    kI, kp = jax.random.split(key)
    I = jax.random.uniform(kI, (B, C, H, W), dtype=jnp.float32)   # guidance in [0,1]
    p = jax.random.uniform(kp, (B, C, H, W), dtype=jnp.float32)   # filter input in [0,1]

    out = guided_filter(I, p, r=r, eps=eps)
    out = jax.block_until_ready(out)

    ref = jax.block_until_ready(_guided_filter_ref(I, p, r=r, eps=eps))
    assert out.shape == (B, C, H, W) and out.dtype == jnp.float32
    assert jnp.max(jnp.abs(out - ref)) < 1e-4, "mismatch vs reference"

    print("KERNEL_OK")
</pallas_src>

<mosaic_0001>
module attributes {stable_mosaic.version = 11 : i64} {
  func.func @_guided_filter_kernel(%arg0: i32, %arg1: memref<16x16xf32, #tpu.memory_space<vmem>>, %arg2: memref<4x16x16xf32, #tpu.memory_space<vmem>>, %arg3: memref<4x16x16xf32, #tpu.memory_space<vmem>>, %arg4: memref<4x16x16xf32, #tpu.memory_space<vmem>>) attributes {dimension_semantics = [#tpu.dimension_semantics<parallel>], iteration_bounds = array<i64: 2>, scalar_prefetch = 0 : i64, scratch_operands = 0 : i64, tpu.core_type = #tpu.core_type<tc>, window_params = [{pipeline_mode = #tpu.pipeline_mode<synchronous>, transform_indices = @transform_0, window_bounds = array<i64: 16, 16>}, {transform_indices = @transform_1, window_bounds = array<i64: 4, 16, 16>}, {transform_indices = @transform_2, window_bounds = array<i64: 4, 16, 16>}, {transform_indices = @transform_3, window_bounds = array<i64: 4, 16, 16>}]} {
    %c0 = arith.constant 0 : index
    %c0_0 = arith.constant 0 : index
    %c0_1 = arith.constant 0 : index
    %0 = vector.load %arg2[%c0, %c0_0, %c0_1] : memref<4x16x16xf32, #tpu.memory_space<vmem>>, vector<4x16x16xf32>
    %c0_2 = arith.constant 0 : index
    %c0_3 = arith.constant 0 : index
    %c0_4 = arith.constant 0 : index
    %1 = vector.load %arg3[%c0_2, %c0_3, %c0_4] : memref<4x16x16xf32, #tpu.memory_space<vmem>>, vector<4x16x16xf32>
    %c0_5 = arith.constant 0 : index
    %c0_6 = arith.constant 0 : index
    %2 = vector.load %arg1[%c0_5, %c0_6] : memref<16x16xf32, #tpu.memory_space<vmem>>, vector<16x16xf32>
    %3 = tpu.iota {dimensions = array<i32: 0>} : vector<16x16xi32>
    %c0_i32 = arith.constant 0 : i32
    %4 = vector.broadcast %c0_i32 : i32 to vector<16x16xi32>
    %5 = arith.addi %3, %4 : vector<16x16xi32>
    %6 = tpu.iota {dimensions = array<i32: 1>} : vector<16x16xi32>
    %c0_i32_7 = arith.constant 0 : i32
    %7 = vector.broadcast %c0_i32_7 : i32 to vector<16x16xi32>
    %8 = arith.addi %6, %7 : vector<16x16xi32>
    %9 = arith.subi %5, %8 : vector<16x16xi32>
    %10 = math.absi %9 : vector<16x16xi32>
    %c4_i32 = arith.constant 4 : i32
    %11 = vector.broadcast %c4_i32 : i32 to vector<16x16xi32>
    %12 = arith.cmpi sle, %10, %11 : vector<16x16xi32>
    %cst = arith.constant 1.000000e+00 : f32
    %cst_8 = arith.constant 0.000000e+00 : f32
    %13 = vector.broadcast %cst : f32 to vector<16x16xf32>
    %14 = vector.broadcast %cst_8 : f32 to vector<16x16xf32>
    %15 = arith.select %12, %13, %14 : vector<16x16xi1>, vector<16x16xf32>
    %16 = tpu.iota {dimensions = array<i32: 0>} : vector<16x16xi32>
    %c0_i32_9 = arith.constant 0 : i32
    %17 = vector.broadcast %c0_i32_9 : i32 to vector<16x16xi32>
    %18 = arith.addi %16, %17 : vector<16x16xi32>
    %19 = tpu.iota {dimensions = array<i32: 1>} : vector<16x16xi32>
    %c0_i32_10 = arith.constant 0 : i32
    %20 = vector.broadcast %c0_i32_10 : i32 to vector<16x16xi32>
    %21 = arith.addi %19, %20 : vector<16x16xi32>
    %22 = arith.subi %18, %21 : vector<16x16xi32>
    %23 = math.absi %22 : vector<16x16xi32>
    %c4_i32_11 = arith.constant 4 : i32
    %24 = vector.broadcast %c4_i32_11 : i32 to vector<16x16xi32>
    %25 = arith.cmpi sle, %23, %24 : vector<16x16xi32>
    %cst_12 = arith.constant 1.000000e+00 : f32
    %cst_13 = arith.constant 0.000000e+00 : f32
    %26 = vector.broadcast %cst_12 : f32 to vector<16x16xf32>
    %27 = vector.broadcast %cst_13 : f32 to vector<16x16xf32>
    %28 = arith.select %25, %26, %27 : vector<16x16xi1>, vector<16x16xf32>
    %29 = arith.mulf %0, %1 : vector<4x16x16xf32>
    %30 = arith.mulf %0, %0 : vector<4x16x16xf32>
    %31 = tpu.concatenate %0, %1, %29, %30 in 0 : vector<4x16x16xf32>, vector<4x16x16xf32>, vector<4x16x16xf32>, vector<4x16x16xf32> -> vector<16x16x16xf32>
    %32 = vector.shape_cast %31 : vector<16x16x16xf32> to vector<256x16xf32>
    %cst_14 = arith.constant dense<0.000000e+00> : vector<256x16xf32>
    %33 = tpu.matmul %32, %28, %cst_14 {dimension_numbers = #tpu.dot_dimension_numbers<[1], [0], [0], [1], [0, 0, 1, 1], [], []>} : vector<256x16xf32>, vector<16x16xf32>, vector<256x16xf32> -> vector<256x16xf32>
    %34 = vector.shape_cast %33 : vector<256x16xf32> to vector<16x16x16xf32>
    %35 = vector.extract_strided_slice %34 {offsets = [0, 0, 0], sizes = [1, 16, 16], strides = [1, 1, 1]} : vector<16x16x16xf32> to vector<1x16x16xf32>
    %36 = vector.shape_cast %35 : vector<1x16x16xf32> to vector<16x16xf32>
    %cst_15 = arith.constant dense<0.000000e+00> : vector<16x16xf32>
    %37 = tpu.matmul %15, %36, %cst_15 {dimension_numbers = #tpu.dot_dimension_numbers<[1], [0], [0], [1], [0, 0, 1, 1], [], []>} : vector<16x16xf32>, vector<16x16xf32>, vector<16x16xf32> -> vector<16x16xf32>
    %38 = vector.extract_strided_slice %34 {offsets = [1, 0, 0], sizes = [1, 16, 16], strides = [1, 1, 1]} : vector<16x16x16xf32> to vector<1x16x16xf32>
    %39 = vector.shape_cast %38 : vector<1x16x16xf32> to vector<16x16xf32>
    %cst_16 = arith.constant dense<0.000000e+00> : vector<16x16xf32>
    %40 = tpu.matmul %15, %39, %cst_16 {dimension_numbers = #tpu.dot_dimension_numbers<[1], [0], [0], [1], [0, 0, 1, 1], [], []>} : vector<16x16xf32>, vector<16x16xf32>, vector<16x16xf32> -> vector<16x16xf32>
    %41 = vector.extract_strided_slice %34 {offsets = [2, 0, 0], sizes = [1, 16, 16], strides = [1, 1, 1]} : vector<16x16x16xf32> to vector<1x16x16xf32>
    %42 = vector.shape_cast %41 : vector<1x16x16xf32> to vector<16x16xf32>
    %cst_17 = arith.constant dense<0.000000e+00> : vector<16x16xf32>
    %43 = tpu.matmul %15, %42, %cst_17 {dimension_numbers = #tpu.dot_dimension_numbers<[1], [0], [0], [1], [0, 0, 1, 1], [], []>} : vector<16x16xf32>, vector<16x16xf32>, vector<16x16xf32> -> vector<16x16xf32>
    %44 = vector.extract_strided_slice %34 {offsets = [3, 0, 0], sizes = [1, 16, 16], strides = [1, 1, 1]} : vector<16x16x16xf32> to vector<1x16x16xf32>
    %45 = vector.shape_cast %44 : vector<1x16x16xf32> to vector<16x16xf32>
    %cst_18 = arith.constant dense<0.000000e+00> : vector<16x16xf32>
    %46 = tpu.matmul %15, %45, %cst_18 {dimension_numbers = #tpu.dot_dimension_numbers<[1], [0], [0], [1], [0, 0, 1, 1], [], []>} : vector<16x16xf32>, vector<16x16xf32>, vector<16x16xf32> -> vector<16x16xf32>
    %47 = vector.extract_strided_slice %34 {offsets = [4, 0, 0], sizes = [1, 16, 16], strides = [1, 1, 1]} : vector<16x16x16xf32> to vector<1x16x16xf32>
    %48 = vector.shape_cast %47 : vector<1x16x16xf32> to vector<16x16xf32>
    %cst_19 = arith.constant dense<0.000000e+00> : vector<16x16xf32>
    %49 = tpu.matmul %15, %48, %cst_19 {dimension_numbers = #tpu.dot_dimension_numbers<[1], [0], [0], [1], [0, 0, 1, 1], [], []>} : vector<16x16xf32>, vector<16x16xf32>, vector<16x16xf32> -> vector<16x16xf32>
    %50 = vector.extract_strided_slice %34 {offsets = [5, 0, 0], sizes = [1, 16, 16], strides = [1, 1, 1]} : vector<16x16x16xf32> to vector<1x16x16xf32>
    %51 = vector.shape_cast %50 : vector<1x16x16xf32> to vector<16x16xf32>
    %cst_20 = arith.constant dense<0.000000e+00> : vector<16x16xf32>
    %52 = tpu.matmul %15, %51, %cst_20 {dimension_numbers = #tpu.dot_dimension_numbers<[1], [0], [0], [1], [0, 0, 1, 1], [], []>} : vector<16x16xf32>, vector<16x16xf32>, vector<16x16xf32> -> vector<16x16xf32>
    %53 = vector.extract_strided_slice %34 {offsets = [6, 0, 0], sizes = [1, 16, 16], strides = [1, 1, 1]} : vector<16x16x16xf32> to vector<1x16x16xf32>
    %54 = vector.shape_cast %53 : vector<1x16x16xf32> to vector<16x16xf32>
    %cst_21 = arith.constant dense<0.000000e+00> : vector<16x16xf32>
    %55 = tpu.matmul %15, %54, %cst_21 {dimension_numbers = #tpu.dot_dimension_numbers<[1], [0], [0], [1], [0, 0, 1, 1], [], []>} : vector<16x16xf32>, vector<16x16xf32>, vector<16x16xf32> -> vector<16x16xf32>
    %56 = vector.extract_strided_slice %34 {offsets = [7, 0, 0], sizes = [1, 16, 16], strides = [1, 1, 1]} : vector<16x16x16xf32> to vector<1x16x16xf32>
    %57 = vector.shape_cast %56 : vector<1x16x16xf32> to vector<16x16xf32>
    %cst_22 = arith.constant dense<0.000000e+00> : vector<16x16xf32>
    %58 = tpu.matmul %15, %57, %cst_22 {dimension_numbers = #tpu.dot_dimension_numbers<[1], [0], [0], [1], [0, 0, 1, 1], [], []>} : vector<16x16xf32>, vector<16x16xf32>, vector<16x16xf32> -> vector<16x16xf32>
    %59 = vector.extract_strided_slice %34 {offsets = [8, 0, 0], sizes = [1, 16, 16], strides = [1, 1, 1]} : vector<16x16x16xf32> to vector<1x16x16xf32>
    %60 = vector.shape_cast %59 : vector<1x16x16xf32> to vector<16x16xf32>
    %cst_23 = arith.constant dense<0.000000e+00> : vector<16x16xf32>
    %61 = tpu.matmul %15, %60, %cst_23 {dimension_numbers = #tpu.dot_dimension_numbers<[1], [0], [0], [1], [0, 0, 1, 1], [], []>} : vector<16x16xf32>, vector<16x16xf32>, vector<16x16xf32> -> vector<16x16xf32>
    %62 = vector.extract_strided_slice %34 {offsets = [9, 0, 0], sizes = [1, 16, 16], strides = [1, 1, 1]} : vector<16x16x16xf32> to vector<1x16x16xf32>
    %63 = vector.shape_cast %62 : vector<1x16x16xf32> to vector<16x16xf32>
    %cst_24 = arith.constant dense<0.000000e+00> : vector<16x16xf32>
    %64 = tpu.matmul %15, %63, %cst_24 {dimension_numbers = #tpu.dot_dimension_numbers<[1], [0], [0], [1], [0, 0, 1, 1], [], []>} : vector<16x16xf32>, vector<16x16xf32>, vector<16x16xf32> -> vector<16x16xf32>
    %65 = vector.extract_strided_slice %34 {offsets = [10, 0, 0], sizes = [1, 16, 16], strides = [1, 1, 1]} : vector<16x16x16xf32> to vector<1x16x16xf32>
    %66 = vector.shape_cast %65 : vector<1x16x16xf32> to vector<16x16xf32>
    %cst_25 = arith.constant dense<0.000000e+00> : vector<16x16xf32>
    %67 = tpu.matmul %15, %66, %cst_25 {dimension_numbers = #tpu.dot_dimension_numbers<[1], [0], [0], [1], [0, 0, 1, 1], [], []>} : vector<16x16xf32>, vector<16x16xf32>, vector<16x16xf32> -> vector<16x16xf32>
    %68 = vector.extract_strided_slice %34 {offsets = [11, 0, 0], sizes = [1, 16, 16], strides = [1, 1, 1]} : vector<16x16x16xf32> to vector<1x16x16xf32>
    %69 = vector.shape_cast %68 : vector<1x16x16xf32> to vector<16x16xf32>
    %cst_26 = arith.constant dense<0.000000e+00> : vector<16x16xf32>
    %70 = tpu.matmul %15, %69, %cst_26 {dimension_numbers = #tpu.dot_dimension_numbers<[1], [0], [0], [1], [0, 0, 1, 1], [], []>} : vector<16x16xf32>, vector<16x16xf32>, vector<16x16xf32> -> vector<16x16xf32>
    %71 = vector.extract_strided_slice %34 {offsets = [12, 0, 0], sizes = [1, 16, 16], strides = [1, 1, 1]} : vector<16x16x16xf32> to vector<1x16x16xf32>
    %72 = vector.shape_cast %71 : vector<1x16x16xf32> to vector<16x16xf32>
    %cst_27 = arith.constant dense<0.000000e+00> : vector<16x16xf32>
    %73 = tpu.matmul %15, %72, %cst_27 {dimension_numbers = #tpu.dot_dimension_numbers<[1], [0], [0], [1], [0, 0, 1, 1], [], []>} : vector<16x16xf32>, vector<16x16xf32>, vector<16x16xf32> -> vector<16x16xf32>
    %74 = vector.extract_strided_slice %34 {offsets = [13, 0, 0], sizes = [1, 16, 16], strides = [1, 1, 1]} : vector<16x16x16xf32> to vector<1x16x16xf32>
    %75 = vector.shape_cast %74 : vector<1x16x16xf32> to vector<16x16xf32>
    %cst_28 = arith.constant dense<0.000000e+00> : vector<16x16xf32>
    %76 = tpu.matmul %15, %75, %cst_28 {dimension_numbers = #tpu.dot_dimension_numbers<[1], [0], [0], [1], [0, 0, 1, 1], [], []>} : vector<16x16xf32>, vector<16x16xf32>, vector<16x16xf32> -> vector<16x16xf32>
    %77 = vector.extract_strided_slice %34 {offsets = [14, 0, 0], sizes = [1, 16, 16], strides = [1, 1, 1]} : vector<16x16x16xf32> to vector<1x16x16xf32>
    %78 = vector.shape_cast %77 : vector<1x16x16xf32> to vector<16x16xf32>
    %cst_29 = arith.constant dense<0.000000e+00> : vector<16x16xf32>
    %79 = tpu.matmul %15, %78, %cst_29 {dimension_numbers = #tpu.dot_dimension_numbers<[1], [0], [0], [1], [0, 0, 1, 1], [], []>} : vector<16x16xf32>, vector<16x16xf32>, vector<16x16xf32> -> vector<16x16xf32>
    %80 = vector.extract_strided_slice %34 {offsets = [15, 0, 0], sizes = [1, 16, 16], strides = [1, 1, 1]} : vector<16x16x16xf32> to vector<1x16x16xf32>
    %81 = vector.shape_cast %80 : vector<1x16x16xf32> to vector<16x16xf32>
    %cst_30 = arith.constant dense<0.000000e+00> : vector<16x16xf32>
    %82 = tpu.matmul %15, %81, %cst_30 {dimension_numbers = #tpu.dot_dimension_numbers<[1], [0], [0], [1], [0, 0, 1, 1], [], []>} : vector<16x16xf32>, vector<16x16xf32>, vector<16x16xf32> -> vector<16x16xf32>
    %83 = vector.shape_cast %37 : vector<16x16xf32> to vector<1x16x16xf32>
    %84 = vector.shape_cast %40 : vector<16x16xf32> to vector<1x16x16xf32>
    %85 = vector.shape_cast %43 : vector<16x16xf32> to vector<1x16x16xf32>
    %86 = vector.shape_cast %46 : vector<16x16xf32> to vector<1x16x16xf32>
    %87 = vector.shape_cast %49 : vector<16x16xf32> to vector<1x16x16xf32>
    %88 = vector.shape_cast %52 : vector<16x16xf32> to vector<1x16x16xf32>
    %89 = vector.shape_cast %55 : vector<16x16xf32> to vector<1x16x16xf32>
    %90 = vector.shape_cast %58 : vector<16x16xf32> to vector<1x16x16xf32>
    %91 = vector.shape_cast %61 : vector<16x16xf32> to vector<1x16x16xf32>
    %92 = vector.shape_cast %64 : vector<16x16xf32> to vector<1x16x16xf32>
    %93 = vector.shape_cast %67 : vector<16x16xf32> to vector<1x16x16xf32>
    %94 = vector.shape_cast %70 : vector<16x16xf32> to vector<1x16x16xf32>
    %95 = vector.shape_cast %73 : vector<16x16xf32> to vector<1x16x16xf32>
    %96 = vector.shape_cast %76 : vector<16x16xf32> to vector<1x16x16xf32>
    %97 = vector.shape_cast %79 : vector<16x16xf32> to vector<1x16x16xf32>
    %98 = vector.shape_cast %82 : vector<16x16xf32> to vector<1x16x16xf32>
    %99 = tpu.concatenate %83, %84, %85, %86, %87, %88, %89, %90, %91, %92, %93, %94, %95, %96, %97, %98 in 0 : vector<1x16x16xf32>, vector<1x16x16xf32>, vector<1x16x16xf32>, vector<1x16x16xf32>, vector<1x16x16xf32>, vector<1x16x16xf32>, vector<1x16x16xf32>, vector<1x16x16xf32>, vector<1x16x16xf32>, vector<1x16x16xf32>, vector<1x16x16xf32>, vector<1x16x16xf32>, vector<1x16x16xf32>, vector<1x16x16xf32>, vector<1x16x16xf32>, vector<1x16x16xf32> -> vector<16x16x16xf32>
    %100 = vector.shape_cast %2 : vector<16x16xf32> to vector<1x16x16xf32>
    %101 = vector.broadcast %100 : vector<1x16x16xf32> to vector<16x16x16xf32>
    %102 = arith.mulf %99, %101 : vector<16x16x16xf32>
    %103 = vector.extract_strided_slice %102 {offsets = [0, 0, 0], sizes = [4, 16, 16], strides = [1, 1, 1]} : vector<16x16x16xf32> to vector<4x16x16xf32>
    %104 = vector.extract_strided_slice %102 {offsets = [4, 0, 0], sizes = [4, 16, 16], strides = [1, 1, 1]} : vector<16x16x16xf32> to vector<4x16x16xf32>
    %105 = vector.extract_strided_slice %102 {offsets = [8, 0, 0], sizes = [4, 16, 16], strides = [1, 1, 1]} : vector<16x16x16xf32> to vector<4x16x16xf32>
    %106 = vector.extract_strided_slice %102 {offsets = [12, 0, 0], sizes = [4, 16, 16], strides = [1, 1, 1]} : vector<16x16x16xf32> to vector<4x16x16xf32>
    %107 = arith.mulf %103, %104 : vector<4x16x16xf32>
    %108 = arith.subf %105, %107 : vector<4x16x16xf32>
    %109 = arith.mulf %103, %103 : vector<4x16x16xf32>
    %110 = arith.subf %106, %109 : vector<4x16x16xf32>
    %cst_31 = arith.constant 1.000000e-03 : f32
    %111 = vector.broadcast %cst_31 : f32 to vector<4x16x16xf32>
    %112 = arith.addf %110, %111 : vector<4x16x16xf32>
    %113 = tpu.reciprocal %112 : vector<4x16x16xf32> -> vector<4x16x16xf32>
    %114 = arith.mulf %108, %113 : vector<4x16x16xf32>
    %115 = arith.mulf %114, %103 : vector<4x16x16xf32>
    %116 = arith.subf %104, %115 : vector<4x16x16xf32>
    %117 = tpu.concatenate %114, %116 in 0 : vector<4x16x16xf32>, vector<4x16x16xf32> -> vector<8x16x16xf32>
    %118 = vector.shape_cast %117 : vector<8x16x16xf32> to vector<128x16xf32>
    %cst_32 = arith.constant dense<0.000000e+00> : vector<128x16xf32>
    %119 = tpu.matmul %118, %28, %cst_32 {dimension_numbers = #tpu.dot_dimension_numbers<[1], [0], [0], [1], [0, 0, 1, 1], [], []>} : vector<128x16xf32>, vector<16x16xf32>, vector<128x16xf32> -> vector<128x16xf32>
    %120 = vector.shape_cast %119 : vector<128x16xf32> to vector<8x16x16xf32>
    %121 = vector.extract_strided_slice %120 {offsets = [0, 0, 0], sizes = [1, 16, 16], strides = [1, 1, 1]} : vector<8x16x16xf32> to vector<1x16x16xf32>
    %122 = vector.shape_cast %121 : vector<1x16x16xf32> to vector<16x16xf32>
    %cst_33 = arith.constant dense<0.000000e+00> : vector<16x16xf32>
    %123 = tpu.matmul %15, %122, %cst_33 {dimension_numbers = #tpu.dot_dimension_numbers<[1], [0], [0], [1], [0, 0, 1, 1], [], []>} : vector<16x16xf32>, vector<16x16xf32>, vector<16x16xf32> -> vector<16x16xf32>
    %124 = vector.extract_strided_slice %120 {offsets = [1, 0, 0], sizes = [1, 16, 16], strides = [1, 1, 1]} : vector<8x16x16xf32> to vector<1x16x16xf32>
    %125 = vector.shape_cast %124 : vector<1x16x16xf32> to vector<16x16xf32>
    %cst_34 = arith.constant dense<0.000000e+00> : vector<16x16xf32>
    %126 = tpu.matmul %15, %125, %cst_34 {dimension_numbers = #tpu.dot_dimension_numbers<[1], [0], [0], [1], [0, 0, 1, 1], [], []>} : vector<16x16xf32>, vector<16x16xf32>, vector<16x16xf32> -> vector<16x16xf32>
    %127 = vector.extract_strided_slice %120 {offsets = [2, 0, 0], sizes = [1, 16, 16], strides = [1, 1, 1]} : vector<8x16x16xf32> to vector<1x16x16xf32>
    %128 = vector.shape_cast %127 : vector<1x16x16xf32> to vector<16x16xf32>
    %cst_35 = arith.constant dense<0.000000e+00> : vector<16x16xf32>
    %129 = tpu.matmul %15, %128, %cst_35 {dimension_numbers = #tpu.dot_dimension_numbers<[1], [0], [0], [1], [0, 0, 1, 1], [], []>} : vector<16x16xf32>, vector<16x16xf32>, vector<16x16xf32> -> vector<16x16xf32>
    %130 = vector.extract_strided_slice %120 {offsets = [3, 0, 0], sizes = [1, 16, 16], strides = [1, 1, 1]} : vector<8x16x16xf32> to vector<1x16x16xf32>
    %131 = vector.shape_cast %130 : vector<1x16x16xf32> to vector<16x16xf32>
    %cst_36 = arith.constant dense<0.000000e+00> : vector<16x16xf32>
    %132 = tpu.matmul %15, %131, %cst_36 {dimension_numbers = #tpu.dot_dimension_numbers<[1], [0], [0], [1], [0, 0, 1, 1], [], []>} : vector<16x16xf32>, vector<16x16xf32>, vector<16x16xf32> -> vector<16x16xf32>
    %133 = vector.extract_strided_slice %120 {offsets = [4, 0, 0], sizes = [1, 16, 16], strides = [1, 1, 1]} : vector<8x16x16xf32> to vector<1x16x16xf32>
    %134 = vector.shape_cast %133 : vector<1x16x16xf32> to vector<16x16xf32>
    %cst_37 = arith.constant dense<0.000000e+00> : vector<16x16xf32>
    %135 = tpu.matmul %15, %134, %cst_37 {dimension_numbers = #tpu.dot_dimension_numbers<[1], [0], [0], [1], [0, 0, 1, 1], [], []>} : vector<16x16xf32>, vector<16x16xf32>, vector<16x16xf32> -> vector<16x16xf32>
    %136 = vector.extract_strided_slice %120 {offsets = [5, 0, 0], sizes = [1, 16, 16], strides = [1, 1, 1]} : vector<8x16x16xf32> to vector<1x16x16xf32>
    %137 = vector.shape_cast %136 : vector<1x16x16xf32> to vector<16x16xf32>
    %cst_38 = arith.constant dense<0.000000e+00> : vector<16x16xf32>
    %138 = tpu.matmul %15, %137, %cst_38 {dimension_numbers = #tpu.dot_dimension_numbers<[1], [0], [0], [1], [0, 0, 1, 1], [], []>} : vector<16x16xf32>, vector<16x16xf32>, vector<16x16xf32> -> vector<16x16xf32>
    %139 = vector.extract_strided_slice %120 {offsets = [6, 0, 0], sizes = [1, 16, 16], strides = [1, 1, 1]} : vector<8x16x16xf32> to vector<1x16x16xf32>
    %140 = vector.shape_cast %139 : vector<1x16x16xf32> to vector<16x16xf32>
    %cst_39 = arith.constant dense<0.000000e+00> : vector<16x16xf32>
    %141 = tpu.matmul %15, %140, %cst_39 {dimension_numbers = #tpu.dot_dimension_numbers<[1], [0], [0], [1], [0, 0, 1, 1], [], []>} : vector<16x16xf32>, vector<16x16xf32>, vector<16x16xf32> -> vector<16x16xf32>
    %142 = vector.extract_strided_slice %120 {offsets = [7, 0, 0], sizes = [1, 16, 16], strides = [1, 1, 1]} : vector<8x16x16xf32> to vector<1x16x16xf32>
    %143 = vector.shape_cast %142 : vector<1x16x16xf32> to vector<16x16xf32>
    %cst_40 = arith.constant dense<0.000000e+00> : vector<16x16xf32>
    %144 = tpu.matmul %15, %143, %cst_40 {dimension_numbers = #tpu.dot_dimension_numbers<[1], [0], [0], [1], [0, 0, 1, 1], [], []>} : vector<16x16xf32>, vector<16x16xf32>, vector<16x16xf32> -> vector<16x16xf32>
    %145 = vector.shape_cast %123 : vector<16x16xf32> to vector<1x16x16xf32>
    %146 = vector.shape_cast %126 : vector<16x16xf32> to vector<1x16x16xf32>
    %147 = vector.shape_cast %129 : vector<16x16xf32> to vector<1x16x16xf32>
    %148 = vector.shape_cast %132 : vector<16x16xf32> to vector<1x16x16xf32>
    %149 = vector.shape_cast %135 : vector<16x16xf32> to vector<1x16x16xf32>
    %150 = vector.shape_cast %138 : vector<16x16xf32> to vector<1x16x16xf32>
    %151 = vector.shape_cast %141 : vector<16x16xf32> to vector<1x16x16xf32>
    %152 = vector.shape_cast %144 : vector<16x16xf32> to vector<1x16x16xf32>
    %153 = tpu.concatenate %145, %146, %147, %148, %149, %150, %151, %152 in 0 : vector<1x16x16xf32>, vector<1x16x16xf32>, vector<1x16x16xf32>, vector<1x16x16xf32>, vector<1x16x16xf32>, vector<1x16x16xf32>, vector<1x16x16xf32>, vector<1x16x16xf32> -> vector<8x16x16xf32>
    %154 = vector.shape_cast %2 : vector<16x16xf32> to vector<1x16x16xf32>
    %155 = vector.broadcast %154 : vector<1x16x16xf32> to vector<8x16x16xf32>
    %156 = arith.mulf %153, %155 : vector<8x16x16xf32>
    %157 = vector.extract_strided_slice %156 {offsets = [0, 0, 0], sizes = [4, 16, 16], strides = [1, 1, 1]} : vector<8x16x16xf32> to vector<4x16x16xf32>
    %158 = arith.mulf %157, %0 : vector<4x16x16xf32>
    %159 = vector.extract_strided_slice %156 {offsets = [4, 0, 0], sizes = [4, 16, 16], strides = [1, 1, 1]} : vector<8x16x16xf32> to vector<4x16x16xf32>
    %160 = arith.addf %158, %159 : vector<4x16x16xf32>
    %c0_41 = arith.constant 0 : index
    %c0_42 = arith.constant 0 : index
    %c0_43 = arith.constant 0 : index
    %161 = vector.load %arg4[%c0_41, %c0_42, %c0_43] : memref<4x16x16xf32, #tpu.memory_space<vmem>>, vector<4x16x16xf32>
    tpu.vector_store %arg4[%c0_41, %c0_42, %c0_43], %160 {strides = array<i32>} : memref<4x16x16xf32, #tpu.memory_space<vmem>>, vector<4x16x16xf32>,
    return
  }
  func.func @transform_0(%arg0: i32) -> (i32, i32) {
    %c0_i32 = arith.constant 0 : i32
    %c0_i32_0 = arith.constant 0 : i32
    %c0_i32_1 = arith.constant 0 : i32
    return %c0_i32, %c0_i32_0 : i32, i32
  }
  func.func @transform_1(%arg0: i32) -> (i32, i32, i32) {
    %c0_i32 = arith.constant 0 : i32
    %c0_i32_0 = arith.constant 0 : i32
    %c0_i32_1 = arith.constant 0 : i32
    return %arg0, %c0_i32, %c0_i32_0 : i32, i32, i32
  }
  func.func @transform_2(%arg0: i32) -> (i32, i32, i32) {
    %c0_i32 = arith.constant 0 : i32
    %c0_i32_0 = arith.constant 0 : i32
    %c0_i32_1 = arith.constant 0 : i32
    return %arg0, %c0_i32, %c0_i32_0 : i32, i32, i32
  }
  func.func @transform_3(%arg0: i32) -> (i32, i32, i32) {
    %c0_i32 = arith.constant 0 : i32
    %c0_i32_0 = arith.constant 0 : i32
    %c0_i32_1 = arith.constant 0 : i32
    return %arg0, %c0_i32, %c0_i32_0 : i32, i32, i32
  }
}

</mosaic_0001>

<bundles_post_ra>
// kernel: tpu_custom_call.1
= control target key start
LH: loop header
LB: loop body
LE: loop exit
PB: predicated region body
PF: predicated region fallthrough
CT: control target
= control target key end

     0   :  { %8 = vsyncpa [#allocation3], 0  ;;  %s4483_s0 = inlined_call_operand.hbm [shape: f32[16,16], index: 0, kind: input, shape index: {}]   ;;  %s4484_s1 = inlined_call_operand.hbm [shape: f32[8,16,16], index: 1, kind: input, shape index: {}]   ;;  %s4485_s2 = inlined_call_operand.hbm [shape: f32[8,16,16], index: 2, kind: input, shape index: {}]   ;;  %s4486_s3 = inlined_call_operand.hbm [shape: f32[8,16,16], index: 3, kind: output, shape index: {}]  }
   0x1   :  { %9 = vsyncpa [#allocation6], 0 }
   0x2   :  { %11 = vsyncpa [#allocation6 + $0x1], 0 }
   0x3   :  { %12 = vsyncpa [#allocation4], 0 }
   0x4   :  { %14 = vsyncpa [#allocation4 + $0x1], 0  ;;  %s3787_s12 = smov 0   ;;  %s3789_s13 = smov 0  }
   0x5   :  { %s3791_s14 = smov 0   ;;  %s3793_s15 = smov 0  }
   0x6 LB: > { %s3808_s16 = sadd.s32 1, %s3755_s15   ;;  %s48_s17 = sadd.s32 1, %s3751_s14  ;;  %s3755_s15 = sphi %s3793_s15, %s4514_s15   ;;  %s3751_s14 = sphi %s3791_s14, %s4513_s14   ;;  %s3747_s13 = sphi %s3789_s13, %s4512_s13   ;;  %s3743_s12 = sphi %s3787_s12, %s4511_s12  }
   0x7   : > { %s45_s18 = ssub.s32 %s3755_s15, %s3808_s16  ;;  %p55_p0 = scmp.ne.s32.totalorder %s3751_s14, %s3747_s13 }
   0x8   : > { %p46_p1 = scmp.eq.s32.totalorder %s45_s18, 0  ;;  %p56_p2 = scmp.eq.s32.totalorder %s3755_s15, 0 }
   0x9   : > { %p3539_p5 = scmp.lt.s32.totalorder %s3755_s15, 2  ;;  %s150_s20 = sand.u32 1, %s3755_s15  }
   0xa   : > { %s3817_s19 = scalar_select %p46_p1, %s3751_s14, %s48_s17  }
   0xb   : > { %p57_p3 = por %p56_p2, %p55_p0  ;;  %s152_s21 = sand.u32 1, %s3751_s14  }
   0xc   : > { %s3826_s22 = sshll.u32 %s152_s21, 6  ;;  %s3008_s23 = sshll.u32 %s3755_s15, 10 }
   0xd   : > { %s3834_s26 = scalar_lea.hbm %s4484_s1, %s3008_s23  ;;  %s154_s27 = scalar_lea.vmem [#allocation5], %s3826_s22 }
   0xe   : > { %s162_s28 = sshll.u32 %s154_s27, 4  ;;  %p3837_p6 = pnand %p3539_p5, %p57_p3  ;;  %s3841_s28 = int_to_ptr.vmem [resolvable:$true] %s162_s28 }
   0xf   : > { %s3843_s30 = scalar_lea.sflag [#allocation6], %s150_s20  ;;  %s3597_s4 = scalar_lea.hbm %s3834_s26, 1024 }
  0x10   : > { %p3598_p7 = scmp.ne.s32.totalorder %s3834_s26, %s3597_s4  ;;  %p3599_p8 = pneg %p3837_p6 }
  0x11   : > { %s3602_s7 = scalar_lea.hbm %s4484_s1, 2048  ;;  %p3603_p11 = scmp.lt.u32.totalorder %s3834_s26, %s4484_s1 }
  0x12   : > { %p3600_p9 = pnand %p3599_p8, %p3598_p7  ;;  %p3604_p12 = scmp.lt.u32.totalorder %s3602_s7, %s3597_s4 }
  0x13   : > { %p3606_p1 = scmp.lt.u32.totalorder %s3597_s4, %s3834_s26 }
  0x14   : > { %p3601_p10 = pneg %p3600_p9  ;;  %p3605_p13 = por %p3604_p12, %p3603_p11 }
  0x16   : > { %p3607_p2 = por %p3606_p1, %p3605_p13 }
  0x18   : > { %p3608_p3 = pnand %p3607_p2, %p3601_p10 }
  0x1a   : > { %3611 = shalt.err (!%p3608_p3)
}
  0x1b   : > { %s3612_s10 = scalar_lea.vmem %s3841_s28, 1024  ;;  %s3757_s11 = smov [#allocation5]  }
  0x1c   : > { %p3613_p5 = scmp.ne.s32.totalorder %s3841_s28, %s3612_s10  ;;  %s3617_s17 = sshll.u32 %s3757_s11, 4  ;;  %s3618_s17 = int_to_ptr.vmem [resolvable:$false] %s3617_s17 }
  0x1d   : > { %s3619_s18 = scalar_lea.vmem %s3618_s17, 2048  ;;  %p3620_p4 = scmp.lt.s32.totalorder %s3841_s28, %s3618_s17 }
  0x1e   : > { %p3615_p7 = pnand %p3613_p5, %p3599_p8  ;;  %p3621_p11 = scmp.lt.s32.totalorder %s3619_s18, %s3612_s10 }
  0x20   : > { %p3616_p9 = pneg %p3615_p7  ;;  %p3622_p12 = por %p3621_p11, %p3620_p4 }
  0x22   : > { %p3623_p13 = pnand %p3622_p12, %p3616_p9 }
  0x24   : > { %3626 = shalt.err (!%p3623_p13)
}
  0x25   : > { %s3758_s20 = smov 128   ;;  %s3759_s21 = smov 8  }
  0x26   : > { %3530 = dma.hbm_to_vmem [thread:$0]  (!%p3837_p6), %s3834_s26, 1024, %s3841_s28, %s3843_s30, %s3758_s20, %s3758_s20, %s3759_s21  }
  0x27   : > { %s176_s24 = scalar_lea.vmem [#allocation7], %s3826_s22  ;;  %s3876_s27 = sadd.s32 4294967295, %s3755_s15  }
  0x28   : > { %s184_s25 = sshll.u32 %s176_s24, 4  ;;  %s2882_s4 = sadd.s32 4294967294, %s3755_s15   ;;  %s3909_s25 = int_to_ptr.vmem [resolvable:$true] %s184_s25 }
  0x29   : > { %p61_p4 = scmp.ne.s32.totalorder %s3747_s13, %s3743_s12  ;;  %p4487_p10 = scmp.eq.s32.totalorder %s3876_s27, 0 }
  0x2a   : > { %p111_p1 = scmp.eq.s32.totalorder %s3876_s27, 1  ;;  %p117_p2 = scmp.eq.s32.totalorder %s2882_s4, 1 }
  0x2b   : > { %p3885_p3 = por %p4487_p10, %p61_p4  ;;  %p2883_p5 = scmp.ge.s32.totalorder %s3755_s15, 1 }
  0x2c   : > { %p3893_p7 = por %p111_p1, %p55_p0  ;;  %p3897_p9 = por %p117_p2, %p61_p4 }
  0x2d   : > { %s4492_s5 = scalar_select %p3885_p3, 1, 0 }
  0x2e   : > { %s4493_s22 = scalar_select %p3893_p7, 1, 0 }
  0x2f   : > { %s4494_s26 = scalar_select %p3897_p9, 1, 0 }
  0x30   : > { %p124_p11 = scmp.lt.s32.totalorder %s3755_s15, 3  ;;  %s3907_s7 = scalar_lea.hbm %s4485_s2, %s3008_s23 }
  0x31   : > { %s3760_s9 = smov [#allocation2]   ;;  %s3627_s11 = scalar_lea.hbm %s3907_s7, 1024 }
  0x32   : > { %p3911_p0 = pnand %p2883_p5, %p124_p11  ;;  %s3915_s10 = sshll.u32 %s3760_s9, 4  ;;  %s137_s10 = int_to_ptr.vmem [resolvable:$true] %s3915_s10 }
  0x33   : > { %p3628_p13 = scmp.ne.s32.totalorder %s3907_s7, %s3627_s11  ;;  %s3632_s18 = scalar_lea.hbm %s4485_s2, 2048 }
  0x34   : > { %s4495_s8 = scalar_select %p3911_p0, 1, 0 }
  0x35   : > { %p3630_p4 = pnand %p3628_p13, %p3599_p8  ;;  %p3633_p2 = scmp.lt.u32.totalorder %s3907_s7, %s4485_s2 }
  0x36   : > { %p3634_p5 = scmp.lt.u32.totalorder %s3632_s18, %s3627_s11  ;;  %p3636_p10 = scmp.lt.u32.totalorder %s3627_s11, %s3907_s7 }
  0x37   : > { %p3631_p1 = pneg %p3630_p4 }
  0x38   : > { %p3635_p11 = por %p3634_p5, %p3633_p2 }
  0x3a   : > { %p3637_p9 = por %p3636_p10, %p3635_p11 }
  0x3c   : > { %p3638_p7 = pnand %p3637_p9, %p3631_p1 }
  0x3e   : > { %3641 = shalt.err (!%p3638_p7)
}
  0x3f   : > { %s3642_s28 = scalar_lea.vmem %s3909_s25, 1024  ;;  %s3761_s6 = smov [#allocation7]  }
  0x40   : > { %p3643_p13 = scmp.ne.s32.totalorder %s3909_s25, %s3642_s28  ;;  %s3647_s9 = sshll.u32 %s3761_s6, 4  ;;  %s3648_s9 = int_to_ptr.vmem [resolvable:$false] %s3647_s9 }
  0x41   : > { %s3649_s23 = scalar_lea.vmem %s3648_s9, 2048  ;;  %p3650_p3 = scmp.lt.s32.totalorder %s3909_s25, %s3648_s9 }
  0x42   : > { %p3645_p4 = pnand %p3643_p13, %p3599_p8  ;;  %p3651_p2 = scmp.lt.s32.totalorder %s3649_s23, %s3642_s28 }
  0x44   : > { %p3646_p12 = pneg %p3645_p4  ;;  %p3652_p5 = por %p3651_p2, %p3650_p3 }
  0x46   : > { %p3653_p10 = pnand %p3652_p5, %p3646_p12 }
  0x48   : > { %3656 = shalt.err (!%p3653_p10)
}
  0x49   : > { %3533 = dma.hbm_to_vmem [thread:$0]  (!%p3837_p6), %s3907_s7, 1024, %s3909_s25, %s3843_s30, %s3758_s20, %s3758_s20, %s3759_s21  }
  0x4a   : > { %p4496_p8 = scmp.eq.s32.totalorder %s3876_s27, 0  ;;  %p4497_p7 = pneg %p3911_p0 }
  0x4b   : > { %s3657_s18 = scalar_lea.hbm %s4483_s0, 256 }
  0x4c   : > { %p3952_p9 = pnand %p4497_p7, %p4496_p8  ;;  %p3658_p3 = scmp.ne.s32.totalorder %s4483_s0, %s3657_s18 }
  0x4d   : > { %p3664_p11 = scmp.lt.u32.totalorder %s3657_s18, %s4483_s0 }
  0x4e   : > { %p3659_p12 = pneg %p3952_p9 }
  0x50   : > { %p3660_p6 = pnand %p3659_p12, %p3658_p3 }
  0x52   : > { %p3661_p1 = pneg %p3660_p6 }
  0x54   : > { %p3666_p13 = pnand %p3664_p11, %p3661_p1 }
  0x56   : > { %3669 = shalt.err (!%p3666_p13)
}
  0x57   : > { %s3670_s7 = scalar_lea.vmem %s137_s10, 256  ;;  %p3678_p10 = scmp.lt.s32.totalorder %s137_s10, %s137_s10 }
  0x58   : > { %p3671_p4 = scmp.ne.s32.totalorder %s137_s10, %s3670_s7  ;;  %p3679_p8 = scmp.lt.s32.totalorder %s3670_s7, %s3670_s7 }
  0x5a   : > { %p3673_p2 = pnand %p3671_p4, %p3659_p12  ;;  %p3680_p7 = por %p3679_p8, %p3678_p10 }
  0x5c   : > { %p3674_p5 = pneg %p3673_p2 }
  0x5e   : > { %p3681_p0 = pnand %p3680_p7, %p3674_p5 }
  0x60   : > { %3684 = shalt.err (!%p3681_p0)
}
  0x61   : > { %3526 = dma.hbm_to_vmem [thread:$0]  (!%p3952_p9), %s4483_s0, 256, %s137_s10, [#allocation3], %s3758_s20, %s3758_s20, %s3759_s21  }
  0x62   : > { %p4499_p3 = scmp.ne.s32.totalorder %s4495_s8, 0 }
  0x63   : > { %p4500_p12 = scmp.eq.s32.totalorder (!%p4499_p3), %s3876_s27, 0 }
  0x64   : > { %196 = sbr.rel (%p4499_p3) target bundleno = 1110 (0x456), region = 32 }
  0x6b   : > { %3730 = dma.done.wait (%p4500_p12), [#allocation3], 256   ;;  %p4501_p6 = pmov %p4500_p12 }
  0x6c   : > { %s202_s9 = sand.u32 1, %s3876_s27   ;;  %s204_s23 = sand.u32 1, %s3747_s13  }
  0x6d   : > { %3732 = vsyncadd (%p4501_p6), [#allocation3], 4294967040  ;;  %s3985_s11 = sshll.u32 %s204_s23, 6  ;;  %s203_s20 = scalar_lea.sflag [#allocation6], %s202_s9 }
  0x6e   : > { %s3988_s21 = scalar_lea.vmem [#allocation5], %s3985_s11  ;;  %p4502_p0 = scmp.ne.s32.totalorder %s4492_s5, 0 }
  0x70   : > { %3734 = dma.done.wait (%p4502_p0), %s203_s20, 2048  }
  0x71   : > { %3736 = vsyncadd (%p4502_p0), %s203_s20, 4294965248  ;;  %v264_v0 = vlaneseq  ;;  %vm297_vm0 = vcmask 130048   ;;  %v3995_v7 = vld [vmem:[%s3988_s21] sm:$0xff]  ;;  %v3762_v11 = vmov 0.0   ;;  %v3763_v14 = vmov 1.0|1.0  }
  0x72   : > { %3165 = vmatprep.mubr.msk.f32.mxu0 %vm297_vm0, %v3995_v7  ;;  %v4006_v15 = vld [vmem:[%s3988_s21 + $0x8] sm:$0xff]  ;;  %v4009_v16 = vld [vmem:[%s3988_s21 + $0x10] sm:$0xff]  ;;  %v4016_v17 = vld [vmem:[%s3988_s21 + $0x18] sm:$0xff]  ;;  %s215_s5 = scalar_lea.vmem [#allocation7], %s3985_s11  ;;  %v289_v38 = vmul.f32 %v3995_v7, %v3995_v7  ;;  %s4398_s8 = scalar_lea.vmem [#allocation8], %s3985_s11 }
  0x73   : > { %v265_v1 = vshrl.u32 %v264_v0, 7  ;;  %v268_v2 = vand.u32 127, %v264_v0  ;;  %v4019_v18 = vld [vmem:[%s3988_s21 + $0x20] sm:$0xff]  ;;  %v4026_v19 = vld [vmem:[%s3988_s21 + $0x28] sm:$0xff]  ;;  %v4029_v20 = vld [vmem:[%s3988_s21 + $0x30] sm:$0xff]  ;;  %v290_v39 = vmul.f32 %v4006_v15, %v4006_v15  ;;  %v291_v40 = vmul.f32 %v4009_v16, %v4009_v16  ;;  %s3012_s10 = sshll.u32 %s3876_s27, 10 }
  0x74   : > { %v4036_v21 = vld [vmem:[%s3988_s21 + $0x38] sm:$0xff]  ;;  %v254_v22 = vld [vmem:[%s215_s5] sm:$0xff]  ;;  %v255_v23 = vld [vmem:[%s215_s5 + $0x8] sm:$0xff]  ;;  %v292_v41 = vmul.f32 %v4016_v17, %v4016_v17  ;;  %v293_v42 = vmul.f32 %v4019_v18, %v4019_v18  ;;  %v294_v43 = vmul.f32 %v4026_v19, %v4026_v19  ;;  %v295_v44 = vmul.f32 %v4029_v20, %v4029_v20  ;;  %s2777_s17 = sshll.u32 %s4398_s8, 4  ;;  %s4431_s27 = scalar_lea.hbm %s4486_s3, %s3012_s10  ;;  %s4433_s17 = int_to_ptr.vmem [resolvable:$true] %s2777_s17 }
  0x75   : > { %v266_v3 = vadd.s32 8, %v265_v1  ;;  %v269_v4 = vsub.s32 %v265_v1, %v268_v2  ;;  %v256_v24 = vld [vmem:[%s215_s5 + $0x10] sm:$0xff]  ;;  %v257_v25 = vld [vmem:[%s215_s5 + $0x18] sm:$0xff]  ;;  %v258_v26 = vld [vmem:[%s215_s5 + $0x20] sm:$0xff]  ;;  %v281_v29 = vmul.f32 %v254_v22, %v3995_v7  ;;  %v282_v31 = vmul.f32 %v255_v23, %v4006_v15  ;;  %s4441_s24 = scalar_lea.sflag [#allocation4], %s204_s23  ;;  %s3685_s4 = scalar_lea.vmem %s4433_s17, 1024 }
  0x76   : > { %v259_v27 = vld [vmem:[%s215_s5 + $0x28] sm:$0xff]  ;;  %v260_v28 = vld [vmem:[%s215_s5 + $0x30] sm:$0xff]  ;;  %v261_v30 = vld [vmem:[%s215_s5 + $0x38] sm:$0xff]  ;;  %v283_v32 = vmul.f32 %v256_v24, %v4009_v16  ;;  %v284_v33 = vmul.f32 %v257_v25, %v4016_v17  ;;  %v285_v34 = vmul.f32 %v258_v26, %v4019_v18  ;;  %v296_v45 = vmul.f32 %v4036_v21, %v4036_v21  ;;  %p3686_p9 = scmp.ne.s32.totalorder %s4433_s17, %s3685_s4  ;;  %p4508_p1 = scmp.ne.s32.totalorder %s4493_s22, 0 }
  0x77   : > { %v270_v5 = vsub.s32 %v266_v3, %v268_v2  ;;  %v272_v6 = vsub.s32 0, %v269_v4  ;;  %v286_v35 = vmul.f32 %v259_v27, %v4026_v19  ;;  %v287_v36 = vmul.f32 %v260_v28, %v4029_v20  ;;  %s3764_s30 = smov [#allocation8]  }
  0x78   : > { %v288_v37 = vmul.f32 %v261_v30, %v4036_v21  ;;  %p3687_p11 = pnand %p3686_p9, %p4508_p1  ;;  %s3689_s25 = sshll.u32 %s3764_s30, 4  ;;  %s3690_s25 = int_to_ptr.vmem [resolvable:$false] %s3689_s25 }
  0x79   : > { %v2899_v8 = vmin.u32 %v272_v6, %v269_v4  ;;  %v275_v9 = vsub.s32 0, %v270_v5  ;;  %s3691_s7 = scalar_lea.vmem %s3690_s25, 2048  ;;  %p3692_p4 = scmp.lt.s32.totalorder %s4433_s17, %s3690_s25 }
  0x7a   : > { %p3688_p13 = pneg %p3687_p11  ;;  %p3693_p2 = scmp.lt.s32.totalorder %s3691_s7, %s3685_s4 }
  0x7b   : > { %v2900_v10 = vmin.u32 %v275_v9, %v270_v5  ;;  %vm277_vm1 = vcmp.le.s32.totalorder %v2899_v8, 4 }
  0x7c   : > { %v3999_v12 = vsel %vm277_vm1, 1.0, %v3762_v11  ;;  %p3694_p5 = por %p3693_p2, %p3692_p4 }
  0x7d   : > { %vm278_vm2 = vcmp.le.s32.totalorder %v2900_v10, 4  ;;  %3217 = vmatprep.mubr.msk.f32.mxu1 %vm297_vm0, %v3999_v12 }
  0x7e   : > { %v4003_v13 = vsel %vm278_vm2, 1.0, %v3762_v11  ;;  %vm3409_vm3 = vmpackc.low %vm278_vm2, %vm277_vm1  ;;  %p3695_p10 = pnand %p3694_p5, %p3688_p13 }
  0x7f   : > { %3410 = vmatprep.subr.msk.bf16.mxu0 %vm3409_vm3, %v3763_v14 }
  0x80   : > { %3412 = vmatpush3.bf16.msk.msra.mxu0 %vm3409_vm3, %v3763_v14 }
  0x81   : > { %3478 = vmatprep.subr.msk.bf16.mxu0 %vm3409_vm3, %v3763_v14 }
  0x83   : > { %3166 = vmatmul.mubr.msk.f32.vlgmr.msra.gmra.mrb[0].mxu0 %vm297_vm0, %v4006_v15 }
  0x84   : > { %3168 = vmatprep.mubr.msk.f32.mxu0 %vm297_vm0, %v4009_v16  ;;  %3480 = vmatpush3.bf16.msk.msra.mxu0 %vm3409_vm3, %v3763_v14 }
  0x87   : > { %3169 = vmatmul.mubr.msk.f32.gmra.mrb[2].mxu0 %vm297_vm0, %v4016_v17 }
  0x88   : > { %3171 = vmatprep.mubr.msk.f32.mxu0 %vm297_vm0, %v4019_v18 }
  0x8b   : > { %3172 = vmatmul.mubr.msk.f32.gmra.mrb[4].mxu0 %vm297_vm0, %v4026_v19 }
  0x8c   : > { %3174 = vmatprep.mubr.msk.f32.mxu0 %vm297_vm0, %v4029_v20 }
  0x8f   : > { %3175 = vmatmul.mubr.msk.f32.gmra.mrb[6].mxu0 %vm297_vm0, %v4036_v21 }
  0x90   : > { %3177 = vmatprep.mubr.msk.f32.mxu0 %vm297_vm0, %v254_v22 }
  0x93   : > { %3178 = vmatmul.mubr.msk.f32.gmra.mrb[8].mxu0 %vm297_vm0, %v255_v23 }
  0x94   : > { %3180 = vmatprep.mubr.msk.f32.mxu0 %vm297_vm0, %v256_v24 }
  0x97   : > { %3181 = vmatmul.mubr.msk.f32.gmra.mrb[10].mxu0 %vm297_vm0, %v257_v25 }
  0x98   : > { %3183 = vmatprep.mubr.msk.f32.mxu0 %vm297_vm0, %v258_v26 }
  0x9b   : > { %3184 = vmatmul.mubr.msk.f32.gmra.mrb[12].mxu0 %vm297_vm0, %v259_v27 }
  0x9c   : > { %3186 = vmatprep.mubr.msk.f32.mxu0 %vm297_vm0, %v260_v28 }
  0x9f   : > { %3187 = vmatmul.mubr.msk.f32.gmra.mrb[14].mxu0 %vm297_vm0, %v261_v30 }
  0xa0   : > { %3189 = vmatprep.mubr.msk.f32.mxu0 %vm297_vm0, %v281_v29 }
  0xa3   : > { %3190 = vmatmul.mubr.msk.f32.gmra.mrb[16].mxu0 %vm297_vm0, %v282_v31 }
  0xa4   : > { %3192 = vmatprep.mubr.msk.f32.mxu0 %vm297_vm0, %v283_v32 }
  0xa7   : > { %3193 = vmatmul.mubr.msk.f32.gmra.mrb[18].mxu0 %vm297_vm0, %v284_v33 }
  0xa8   : > { %3195 = vmatprep.mubr.msk.f32.mxu0 %vm297_vm0, %v285_v34 }
  0xab   : > { %3196 = vmatmul.mubr.msk.f32.gmra.mrb[20].mxu0 %vm297_vm0, %v286_v35 }
  0xac   : > { %3198 = vmatprep.mubr.msk.f32.mxu0 %vm297_vm0, %v287_v36 }
  0xaf   : > { %3199 = vmatmul.mubr.msk.f32.gmra.mrb[22].mxu0 %vm297_vm0, %v288_v37 }
  0xb0   : > { %3201 = vmatprep.mubr.msk.f32.mxu0 %vm297_vm0, %v289_v38 }
  0xb3   : > { %3202 = vmatmul.mubr.msk.f32.gmra.mrb[24].mxu0 %vm297_vm0, %v290_v39 }
  0xb4   : > { %3204 = vmatprep.mubr.msk.f32.mxu0 %vm297_vm0, %v291_v40 }
  0xb7   : > { %3205 = vmatmul.mubr.msk.f32.gmra.mrb[26].mxu0 %vm297_vm0, %v292_v41 }
  0xb8   : > { %3207 = vmatprep.mubr.msk.f32.mxu0 %vm297_vm0, %v293_v42 }
  0xbb   : > { %3208 = vmatmul.mubr.msk.f32.gmra.mrb[28].mxu0 %vm297_vm0, %v294_v43 }
  0xbc   : > { %3210 = vmatprep.mubr.msk.f32.mxu0 %vm297_vm0, %v295_v44 }
  0xbf   : > { %3211 = vmatmul.mubr.msk.f32.gmra.mrb[30].mxu0 %vm297_vm0, %v296_v45 }
 0x156   : > { %v3167_v46 = vpop.f32.mrb[0].mxu0 }
 0x157   : > { %v460_v47 = vpop.f32.mrb[1].mxu0 }
 0x158   : > { %v3413_v48 = vpack.c.bf16 %v3167_v46, %v460_v47 }
 0x15a   : > { %v3170_v49 = vpop.f32.mrb[2].mxu0  ;;  %3414 = vmatprep.subr.bf16.mxu1 %v3413_v48 }
 0x15b   : > { %v470_v50 = vpop.f32.mrb[3].mxu0  ;;  %3416 = vmatpush3.bf16.msra.mxu1 %v3413_v48  ;;  %v4153_v48 = vld [vmem:[#allocation2 + $0x8] sm:$0xff] }
 0x15c   : > { %v3417_v51 = vpack.c.bf16 %v3170_v49, %v470_v50  ;;  %v4155_v49 = vld [vmem:[#allocation2] sm:$0xff] }
 0x15e   : > { %v3173_v52 = vpop.f32.mrb[4].mxu0  ;;  %3218 = vmatmul.mubr.msk.f32.vlgmr.msra.gmra.mrb[0].mxu1 %vm297_vm0, %v4003_v13  ;;  %3418 = vmatprep.subr.bf16.mxu1 %v3417_v51 }
 0x15f   : > { %v480_v53 = vpop.f32.mrb[5].mxu0  ;;  %3420 = vmatpush3.bf16.msra.mxu1 %v3417_v51  ;;  %3224 = vmatprep.mubr.msk.f32.mxu1 %vm297_vm0, %v3999_v12 }
 0x160   : > { %v3421_v54 = vpack.c.bf16 %v3173_v52, %v480_v53 }
 0x162   : > { %v3176_v55 = vpop.f32.mrb[6].mxu0  ;;  %3225 = vmatmul.mubr.msk.f32.vlgmr.msra.gmra.mrb[2].mxu1 %vm297_vm0, %v4003_v13  ;;  %3422 = vmatprep.subr.bf16.mxu1 %v3421_v54 }
 0x163   : > { %v490_v56 = vpop.f32.mrb[7].mxu0  ;;  %3424 = vmatpush3.bf16.msra.mxu1 %v3421_v54  ;;  %3231 = vmatprep.mubr.msk.f32.mxu1 %vm297_vm0, %v3999_v12 }
 0x164   : > { %v3425_v57 = vpack.c.bf16 %v3176_v55, %v490_v56 }
 0x166   : > { %v3179_v58 = vpop.f32.mrb[8].mxu0  ;;  %3232 = vmatmul.mubr.msk.f32.vlgmr.msra.gmra.mrb[4].mxu1 %vm297_vm0, %v4003_v13  ;;  %3426 = vmatprep.subr.bf16.mxu1 %v3425_v57 }
 0x167   : > { %v500_v59 = vpop.f32.mrb[9].mxu0  ;;  %3428 = vmatpush3.bf16.msra.mxu1 %v3425_v57  ;;  %3238 = vmatprep.mubr.msk.f32.mxu1 %vm297_vm0, %v3999_v12 }
 0x168   : > { %v3429_v60 = vpack.c.bf16 %v3179_v58, %v500_v59 }
 0x16a   : > { %v3182_v61 = vpop.f32.mrb[10].mxu0  ;;  %3239 = vmatmul.mubr.msk.f32.vlgmr.msra.gmra.mrb[6].mxu1 %vm297_vm0, %v4003_v13  ;;  %3430 = vmatprep.subr.bf16.mxu1 %v3429_v60 }
 0x16b   : > { %v510_v62 = vpop.f32.mrb[11].mxu0  ;;  %3432 = vmatpush3.bf16.msra.mxu1 %v3429_v60  ;;  %3245 = vmatprep.mubr.msk.f32.mxu1 %vm297_vm0, %v3999_v12 }
 0x16c   : > { %v3433_v63 = vpack.c.bf16 %v3182_v61, %v510_v62 }
 0x16e   : > { %v3185_v0 = vpop.f32.mrb[12].mxu0  ;;  %3246 = vmatmul.mubr.msk.f32.vlgmr.msra.gmra.mrb[8].mxu1 %vm297_vm0, %v4003_v13  ;;  %3434 = vmatprep.subr.bf16.mxu1 %v3433_v63 }
 0x16f   : > { %v520_v1 = vpop.f32.mrb[13].mxu0  ;;  %3436 = vmatpush3.bf16.msra.mxu1 %v3433_v63  ;;  %3252 = vmatprep.mubr.msk.f32.mxu1 %vm297_vm0, %v3999_v12 }
 0x170   : > { %v3437_v2 = vpack.c.bf16 %v3185_v0, %v520_v1 }
 0x172   : > { %v3188_v3 = vpop.f32.mrb[14].mxu0  ;;  %3253 = vmatmul.mubr.msk.f32.vlgmr.msra.gmra.mrb[10].mxu1 %vm297_vm0, %v4003_v13  ;;  %3438 = vmatprep.subr.bf16.mxu1 %v3437_v2 }
 0x173   : > { %v530_v4 = vpop.f32.mrb[15].mxu0  ;;  %3440 = vmatpush3.bf16.msra.mxu1 %v3437_v2  ;;  %3259 = vmatprep.mubr.msk.f32.mxu1 %vm297_vm0, %v3999_v12 }
 0x174   : > { %v3441_v5 = vpack.c.bf16 %v3188_v3, %v530_v4 }
 0x176   : > { %v3191_v6 = vpop.f32.mrb[16].mxu0  ;;  %3260 = vmatmul.mubr.msk.f32.vlgmr.msra.gmra.mrb[12].mxu1 %vm297_vm0, %v4003_v13  ;;  %3442 = vmatprep.subr.bf16.mxu1 %v3441_v5 }
 0x177   : > { %v540_v8 = vpop.f32.mrb[17].mxu0  ;;  %3444 = vmatpush3.bf16.msra.mxu1 %v3441_v5  ;;  %3266 = vmatprep.mubr.msk.f32.mxu1 %vm297_vm0, %v3999_v12 }
 0x178   : > { %v3445_v9 = vpack.c.bf16 %v3191_v6, %v540_v8 }
 0x17a   : > { %v3194_v10 = vpop.f32.mrb[18].mxu0  ;;  %3267 = vmatmul.mubr.msk.f32.vlgmr.msra.gmra.mrb[14].mxu1 %vm297_vm0, %v4003_v13  ;;  %3446 = vmatprep.subr.bf16.mxu1 %v3445_v9 }
 0x17b   : > { %v550_v11 = vpop.f32.mrb[19].mxu0  ;;  %3448 = vmatpush3.bf16.msra.mxu1 %v3445_v9  ;;  %3273 = vmatprep.mubr.msk.f32.mxu1 %vm297_vm0, %v3999_v12 }
 0x17c   : > { %v3449_v14 = vpack.c.bf16 %v3194_v10, %v550_v11 }
 0x17e   : > { %v3197_v22 = vpop.f32.mrb[20].mxu0  ;;  %3274 = vmatmul.mubr.msk.f32.vlgmr.msra.gmra.mrb[16].mxu1 %vm297_vm0, %v4003_v13  ;;  %3450 = vmatprep.subr.bf16.mxu1 %v3449_v14 }
 0x17f   : > { %v560_v23 = vpop.f32.mrb[21].mxu0  ;;  %3452 = vmatpush3.bf16.msra.mxu1 %v3449_v14  ;;  %3280 = vmatprep.mubr.msk.f32.mxu1 %vm297_vm0, %v3999_v12 }
 0x180   : > { %v3453_v24 = vpack.c.bf16 %v3197_v22, %v560_v23 }
 0x182   : > { %v3200_v25 = vpop.f32.mrb[22].mxu0  ;;  %3281 = vmatmul.mubr.msk.f32.vlgmr.msra.gmra.mrb[18].mxu1 %vm297_vm0, %v4003_v13  ;;  %3454 = vmatprep.subr.bf16.mxu1 %v3453_v24 }
 0x183   : > { %v570_v26 = vpop.f32.mrb[23].mxu0  ;;  %3456 = vmatpush3.bf16.msra.mxu1 %v3453_v24  ;;  %3287 = vmatprep.mubr.msk.f32.mxu1 %vm297_vm0, %v3999_v12 }
 0x184   : > { %v3457_v27 = vpack.c.bf16 %v3200_v25, %v570_v26 }
 0x186   : > { %v3203_v28 = vpop.f32.mrb[24].mxu0  ;;  %3288 = vmatmul.mubr.msk.f32.vlgmr.msra.gmra.mrb[20].mxu1 %vm297_vm0, %v4003_v13  ;;  %3458 = vmatprep.subr.bf16.mxu1 %v3457_v27 }
 0x187   : > { %v580_v29 = vpop.f32.mrb[25].mxu0  ;;  %3460 = vmatpush3.bf16.msra.mxu1 %v3457_v27  ;;  %3294 = vmatprep.mubr.msk.f32.mxu1 %vm297_vm0, %v3999_v12 }
 0x188   : > { %v3461_v30 = vpack.c.bf16 %v3203_v28, %v580_v29 }
 0x18a   : > { %v3206_v31 = vpop.f32.mrb[26].mxu0  ;;  %3295 = vmatmul.mubr.msk.f32.vlgmr.msra.gmra.mrb[22].mxu1 %vm297_vm0, %v4003_v13  ;;  %3462 = vmatprep.subr.bf16.mxu1 %v3461_v30 }
 0x18b   : > { %v590_v32 = vpop.f32.mrb[27].mxu0  ;;  %3464 = vmatpush3.bf16.msra.mxu1 %v3461_v30  ;;  %3301 = vmatprep.mubr.msk.f32.mxu1 %vm297_vm0, %v3999_v12 }
 0x18c   : > { %v3465_v33 = vpack.c.bf16 %v3206_v31, %v590_v32 }
 0x18e   : > { %v3209_v34 = vpop.f32.mrb[28].mxu0  ;;  %3302 = vmatmul.mubr.msk.f32.vlgmr.msra.gmra.mrb[24].mxu1 %vm297_vm0, %v4003_v13  ;;  %3466 = vmatprep.subr.bf16.mxu1 %v3465_v33 }
 0x18f   : > { %v600_v35 = vpop.f32.mrb[29].mxu0  ;;  %3468 = vmatpush3.bf16.msra.mxu1 %v3465_v33  ;;  %3308 = vmatprep.mubr.msk.f32.mxu1 %vm297_vm0, %v3999_v12 }
 0x190   : > { %v3469_v36 = vpack.c.bf16 %v3209_v34, %v600_v35 }
 0x192   : > { %v3212_v37 = vpop.f32.mrb[30].mxu0  ;;  %3309 = vmatmul.mubr.msk.f32.vlgmr.msra.gmra.mrb[26].mxu1 %vm297_vm0, %v4003_v13  ;;  %3470 = vmatprep.subr.bf16.mxu1 %v3469_v36 }
 0x193   : > { %v610_v38 = vpop.f32.mrb[31].mxu0  ;;  %3472 = vmatpush3.bf16.msra.mxu1 %v3469_v36  ;;  %3315 = vmatprep.mubr.msk.f32.mxu1 %vm297_vm0, %v3999_v12 }
 0x194   : > { %v3473_v39 = vpack.c.bf16 %v3212_v37, %v610_v38 }
 0x196   : > { %3316 = vmatmul.mubr.msk.f32.vlgmr.msra.gmra.mrb[28].mxu1 %vm297_vm0, %v4003_v13  ;;  %3474 = vmatprep.subr.bf16.mxu1 %v3473_v39 }
 0x197   : > { %3476 = vmatpush3.bf16.msra.mxu1 %v3473_v39  ;;  %3322 = vmatprep.mubr.msk.f32.mxu1 %vm297_vm0, %v3999_v12 }
 0x19a   : > { %3323 = vmatmul.mubr.msk.f32.vlgmr.msra.gmra.mrb[30].mxu1 %vm297_vm0, %v4003_v13 }
 0x19b   : > { %3357 = vmatprep.mubr.msk.f32.mxu1 %vm297_vm0, %v3999_v12 }
 0x231   : > { %v3219_v40 = vpop.f32.mrb[0].mxu1 }
 0x232   : > { %v691_v41 = vpop.f32.mrb[1].mxu1  ;;  %v4158_v51 = vmul.f32 %v3219_v40, %v4153_v48 }
 0x233   : > { %v4164_v54 = vmul.f32 %v691_v41, %v4155_v49 }
 0x235   : > { %v3226_v42 = vpop.f32.mrb[2].mxu1 }
 0x236   : > { %v766_v43 = vpop.f32.mrb[3].mxu1  ;;  %v4178_v59 = vmul.f32 %v3226_v42, %v4153_v48 }
 0x237   : > { %v4184_v62 = vmul.f32 %v766_v43, %v4155_v49 }
 0x239   : > { %v3233_v44 = vpop.f32.mrb[4].mxu1 }
 0x23a   : > { %v841_v45 = vpop.f32.mrb[5].mxu1  ;;  %v4198_v3 = vmul.f32 %v3233_v44, %v4153_v48 }
 0x23b   : > { %v4204_v6 = vmul.f32 %v841_v45, %v4155_v49  ;;  %v1875_v45 = vmul.f32 %v4184_v62, %v4184_v62 }
 0x23d   : > { %v3240_v46 = vpop.f32.mrb[6].mxu1 }
 0x23e   : > { %v916_v47 = vpop.f32.mrb[7].mxu1  ;;  %v4218_v14 = vmul.f32 %v3240_v46, %v4153_v48 }
 0x23f   : > { %v4224_v24 = vmul.f32 %v916_v47, %v4155_v49 }
 0x241   : > { %v3247_v50 = vpop.f32.mrb[8].mxu1 }
 0x242   : > { %v4161_v52 = vmul.f32 %v3247_v50, %v4153_v48  ;;  %v991_v53 = vpop.f32.mrb[9].mxu1 }
 0x243   : > { %v4167_v55 = vmul.f32 %v991_v53, %v4155_v49 }
 0x244   : > { %v4171_v56 = vmul.f32 %v4161_v52, %v4158_v51 }
 0x245   : > { %v4175_v57 = vmul.f32 %v4167_v55, %v4164_v54  ;;  %v3254_v58 = vpop.f32.mrb[10].mxu1 }
 0x246   : > { %v4181_v60 = vmul.f32 %v3254_v58, %v4153_v48  ;;  %v1066_v61 = vpop.f32.mrb[11].mxu1 }
 0x247   : > { %v4187_v63 = vmul.f32 %v1066_v61, %v4155_v49 }
 0x248   : > { %v4191_v0 = vmul.f32 %v4181_v60, %v4178_v59 }
 0x249   : > { %v4195_v1 = vmul.f32 %v4187_v63, %v4184_v62  ;;  %v3261_v2 = vpop.f32.mrb[12].mxu1 }
 0x24a   : > { %v4201_v4 = vmul.f32 %v3261_v2, %v4153_v48  ;;  %v1141_v5 = vpop.f32.mrb[13].mxu1 }
 0x24b   : > { %v4207_v8 = vmul.f32 %v1141_v5, %v4155_v49 }
 0x24c   : > { %v4211_v9 = vmul.f32 %v4201_v4, %v4198_v3 }
 0x24d   : > { %v4215_v10 = vmul.f32 %v4207_v8, %v4204_v6  ;;  %v3268_v11 = vpop.f32.mrb[14].mxu1 }
 0x24e   : > { %v4221_v22 = vmul.f32 %v3268_v11, %v4153_v48  ;;  %v1216_v23 = vpop.f32.mrb[15].mxu1  ;;  %v1874_v11 = vmul.f32 %v4158_v51, %v4158_v51 }
 0x24f   : > { %v4227_v25 = vmul.f32 %v1216_v23, %v4155_v49 }
 0x250   : > { %v4231_v26 = vmul.f32 %v4221_v22, %v4218_v14 }
 0x251   : > { %v4235_v27 = vmul.f32 %v4227_v25, %v4224_v24  ;;  %v3275_v28 = vpop.f32.mrb[16].mxu1 }
 0x252   : > { %v4238_v29 = vmul.f32 %v3275_v28, %v4153_v48  ;;  %v1291_v30 = vpop.f32.mrb[17].mxu1 }
 0x253   : > { %v4241_v31 = vmul.f32 %v1291_v30, %v4155_v49  ;;  %v1873_v30 = vmul.f32 %v4164_v54, %v4164_v54 }
 0x254   : > { %v1866_v32 = vsub.f32 %v4238_v29, %v4171_v56 }
 0x255   : > { %v1865_v33 = vsub.f32 %v4241_v31, %v4175_v57  ;;  %v3282_v34 = vpop.f32.mrb[18].mxu1 }
 0x256   : > { %v4248_v35 = vmul.f32 %v3282_v34, %v4153_v48  ;;  %v1366_v36 = vpop.f32.mrb[19].mxu1 }
 0x257   : > { %v4251_v37 = vmul.f32 %v1366_v36, %v4155_v49 }
 0x258   : > { %v1868_v38 = vsub.f32 %v4248_v35, %v4191_v0 }
 0x259   : > { %v3289_v40 = vpop.f32.mrb[20].mxu1  ;;  %v4503_v57 = vsub.f32 %v4251_v37, %v4195_v1 }
 0x25a   : > { %v4258_v41 = vmul.f32 %v3289_v40, %v4153_v48  ;;  %v1441_v42 = vpop.f32.mrb[21].mxu1 }
 0x25b   : > { %v4261_v43 = vmul.f32 %v1441_v42, %v4155_v49 }
 0x25c   : > { %v4504_v0 = vsub.f32 %v4258_v41, %v4211_v9 }
 0x25d   : > { %v3296_v46 = vpop.f32.mrb[22].mxu1  ;;  %v4505_v1 = vsub.f32 %v4261_v43, %v4215_v10 }
 0x25e   : > { %v4268_v47 = vmul.f32 %v3296_v46, %v4153_v48  ;;  %v1516_v50 = vpop.f32.mrb[23].mxu1 }
 0x25f   : > { %v4271_v53 = vmul.f32 %v1516_v50, %v4155_v49  ;;  %v1876_v50 = vmul.f32 %v4178_v59, %v4178_v59 }
 0x260   : > { %v4506_v9 = vsub.f32 %v4268_v47, %v4231_v26 }
 0x261   : > { %v3303_v2 = vpop.f32.mrb[24].mxu1  ;;  %v4507_v10 = vsub.f32 %v4271_v53, %v4235_v27 }
 0x262   : > { %v1850_v5 = vmul.f32 %v3303_v2, %v4153_v48  ;;  %v1591_v23 = vpop.f32.mrb[25].mxu1 }
 0x263   : > { %v1849_v28 = vmul.f32 %v1591_v23, %v4155_v49 }
 0x264   : > { %v1882_v34 = vsub.f32 %v1850_v5, %v1874_v11 }
 0x265   : > { %v1881_v36 = vsub.f32 %v1849_v28, %v1873_v30  ;;  %v3310_v40 = vpop.f32.mrb[26].mxu1  ;;  %v1878_v30 = vmul.f32 %v4198_v3, %v4198_v3 }
 0x266   : > { %v1890_v42 = vadd.f32 0.001, %v1882_v34  ;;  %v1852_v46 = vmul.f32 %v3310_v40, %v4153_v48  ;;  %v1666_v61 = vpop.f32.mrb[27].mxu1 }
 0x267   : > { %v1889_v2 = vadd.f32 0.001, %v1881_v36  ;;  %v1851_v58 = vmul.f32 %v1666_v61, %v4155_v49  ;;  %v1877_v61 = vmul.f32 %v4204_v6, %v4204_v6 }
 0x268   : > { %3581 = vrcp.f32 %v1890_v42  ;;  %v1884_v23 = vsub.f32 %v1852_v46, %v1876_v50  ;;  %v1880_v50 = vmul.f32 %v4218_v14, %v4218_v14 }
 0x269   : > { %3583 = vrcp.f32 %v1889_v2  ;;  %v1883_v44 = vsub.f32 %v1851_v58, %v1875_v45  ;;  %v3317_v5 = vpop.f32.mrb[28].mxu1 }
 0x26a   : > { %v1892_v11 = vadd.f32 0.001, %v1884_v23  ;;  %v1854_v28 = vmul.f32 %v3317_v5, %v4153_v48  ;;  %v1741_v34 = vpop.f32.mrb[29].mxu1  ;;  %v1879_v5 = vmul.f32 %v4224_v24, %v4224_v24 }
 0x26b   : > { %v1891_v40 = vadd.f32 0.001, %v1883_v44  ;;  %v1853_v36 = vmul.f32 %v1741_v34, %v4155_v49 }
 0x26c   : > { %3585 = vrcp.f32 %v1892_v11  ;;  %v1886_v39 = vsub.f32 %v1854_v28, %v1878_v30 }
 0x26d   : > { %3587 = vrcp.f32 %v1891_v40  ;;  %v1885_v42 = vsub.f32 %v1853_v36, %v1877_v61  ;;  %v3324_v46 = vpop.f32.mrb[30].mxu1 }
 0x26e   : > { %v1894_v45 = vadd.f32 0.001, %v1886_v39  ;;  %v1856_v58 = vmul.f32 %v3324_v46, %v4153_v48  ;;  %v1816_v2 = vpop.f32.mrb[31].mxu1 }
 0x26f   : > { %v1893_v23 = vadd.f32 0.001, %v1885_v42  ;;  %v1855_v44 = vmul.f32 %v1816_v2, %v4155_v49 }
 0x270   : > { %3589 = vrcp.f32 %v1894_v45  ;;  %v1888_v34 = vsub.f32 %v1856_v58, %v1880_v50 }
 0x271   : > { %3591 = vrcp.f32 %v1893_v23  ;;  %v1887_v11 = vsub.f32 %v1855_v44, %v1879_v5 }
 0x272   : > { %v3582_v28 = vpop.eup %3581  ;;  %v1896_v30 = vadd.f32 0.001, %v1888_v34 }
 0x273   : > { %v3584_v40 = vpop.eup %3583  ;;  %v1906_v39 = vmul.f32 %v3582_v28, %v1866_v32  ;;  %v1895_v36 = vadd.f32 0.001, %v1887_v11 }
 0x274   : > { %3593 = vrcp.f32 %v1896_v30  ;;  %v1905_v61 = vmul.f32 %v3584_v40, %v1865_v33 }
 0x275   : > { %3595 = vrcp.f32 %v1895_v36  ;;  %v1914_v42 = vmul.f32 %v1906_v39, %v4158_v51 }
 0x276   : > { %v3586_v46 = vpop.eup %3585  ;;  %3329 = vmatprep.mubr.msk.f32.mxu0 %vm297_vm0, %v1905_v61  ;;  %v1913_v45 = vmul.f32 %v1905_v61, %v4164_v54 }
 0x277   : > { %v3588_v58 = vpop.eup %3587  ;;  %3330 = vmatmul.mubr.msk.f32.vlgmr.msra.gmra.mrb[32].mxu0 %vm297_vm0, %v1906_v39  ;;  %v1908_v56 = vmul.f32 %v3586_v46, %v1868_v38  ;;  %v1922_v29 = vsub.f32 %v4161_v52, %v1914_v42 }
 0x278   : > { %v1907_v31 = vmul.f32 %v3588_v58, %v4503_v57  ;;  %v1921_v51 = vsub.f32 %v4167_v55, %v1913_v45 }
 0x279   : > { %v1916_v32 = vmul.f32 %v1908_v56, %v4178_v59 }
 0x27a   : > { %v3590_v33 = vpop.eup %3589  ;;  %3332 = vmatprep.mubr.msk.f32.mxu0 %vm297_vm0, %v1907_v31  ;;  %v1915_v54 = vmul.f32 %v1907_v31, %v4184_v62 }
 0x27b   : > { %v3592_v50 = vpop.eup %3591  ;;  %3333 = vmatmul.mubr.msk.f32.gmra.mrb[34].mxu0 %vm297_vm0, %v1908_v56  ;;  %v1910_v52 = vmul.f32 %v3590_v33, %v4504_v0  ;;  %v1924_v35 = vsub.f32 %v4181_v60, %v1916_v32 }
 0x27c   : > { %v1909_v55 = vmul.f32 %v3592_v50, %v4505_v1  ;;  %v1923_v59 = vsub.f32 %v4187_v63, %v1915_v54 }
 0x27d   : > { %v1918_v37 = vmul.f32 %v1910_v52, %v4198_v3 }
 0x27e   : > { %v3594_v38 = vpop.eup %3593  ;;  %3335 = vmatprep.mubr.msk.f32.mxu0 %vm297_vm0, %v1909_v55  ;;  %v1917_v62 = vmul.f32 %v1909_v55, %v4204_v6 }
 0x27f   : > { %v3596_v2 = vpop.eup %3595  ;;  %3336 = vmatmul.mubr.msk.f32.gmra.mrb[36].mxu0 %vm297_vm0, %v1910_v52  ;;  %v1912_v60 = vmul.f32 %v3594_v38, %v4506_v9  ;;  %v1926_v41 = vsub.f32 %v4201_v4, %v1918_v37 }
 0x280   : > { %v1911_v63 = vmul.f32 %v3596_v2, %v4507_v10  ;;  %v1925_v3 = vsub.f32 %v4207_v8, %v1917_v62 }
 0x281   : > { %v1920_v43 = vmul.f32 %v1912_v60, %v4218_v14 }
 0x282   : > { %3338 = vmatprep.mubr.msk.f32.mxu0 %vm297_vm0, %v1911_v63  ;;  %v1919_v6 = vmul.f32 %v1911_v63, %v4224_v24 }
 0x283   : > { %3339 = vmatmul.mubr.msk.f32.gmra.mrb[38].mxu0 %vm297_vm0, %v1912_v60  ;;  %v1928_v23 = vsub.f32 %v4221_v22, %v1920_v43 }
 0x284   : > { %3341 = vmatprep.mubr.msk.f32.mxu0 %vm297_vm0, %v1921_v51  ;;  %v1927_v4 = vsub.f32 %v4227_v25, %v1919_v6 }
 0x287   : > { %3342 = vmatmul.mubr.msk.f32.gmra.mrb[40].mxu0 %vm297_vm0, %v1922_v29 }
 0x288   : > { %3344 = vmatprep.mubr.msk.f32.mxu0 %vm297_vm0, %v1923_v59 }
 0x28b   : > { %3345 = vmatmul.mubr.msk.f32.gmra.mrb[42].mxu0 %vm297_vm0, %v1924_v35 }
 0x28c   : > { %3347 = vmatprep.mubr.msk.f32.mxu0 %vm297_vm0, %v1925_v3 }
 0x28f   : > { %3348 = vmatmul.mubr.msk.f32.gmra.mrb[44].mxu0 %vm297_vm0, %v1926_v41 }
 0x290   : > { %3350 = vmatprep.mubr.msk.f32.mxu0 %vm297_vm0, %v1927_v4 }
 0x293   : > { %3351 = vmatmul.mubr.msk.f32.gmra.mrb[46].mxu0 %vm297_vm0, %v1928_v23 }
 0x34a   : > { %v3331_v8 = vpop.f32.mrb[32].mxu0 }
 0x34b   : > { %v2043_v14 = vpop.f32.mrb[33].mxu0 }
 0x34c   : > { %v3481_v22 = vpack.c.bf16 %v3331_v8, %v2043_v14 }
 0x34e   : > { %v3334_v24 = vpop.f32.mrb[34].mxu0  ;;  %3482 = vmatprep.subr.bf16.mxu1 %v3481_v22 }
 0x34f   : > { %v2053_v25 = vpop.f32.mrb[35].mxu0  ;;  %3484 = vmatpush3.bf16.msra.mxu1 %v3481_v22 }
 0x350   : > { %v3485_v26 = vpack.c.bf16 %v3334_v24, %v2053_v25 }
 0x352   : > { %v3337_v27 = vpop.f32.mrb[36].mxu0  ;;  %3358 = vmatmul.mubr.msk.f32.vlgmr.msra.gmra.mrb[32].mxu1 %vm297_vm0, %v4003_v13  ;;  %3486 = vmatprep.subr.bf16.mxu1 %v3485_v26 }
 0x353   : > { %v2063_v47 = vpop.f32.mrb[37].mxu0  ;;  %3488 = vmatpush3.bf16.msra.mxu1 %v3485_v26  ;;  %3364 = vmatprep.mubr.msk.f32.mxu1 %vm297_vm0, %v3999_v12 }
 0x354   : > { %v3489_v53 = vpack.c.bf16 %v3337_v27, %v2063_v47 }
 0x356   : > { %v3340_v44 = vpop.f32.mrb[38].mxu0  ;;  %3365 = vmatmul.mubr.msk.f32.vlgmr.msra.gmra.mrb[34].mxu1 %vm297_vm0, %v4003_v13  ;;  %3490 = vmatprep.subr.bf16.mxu1 %v3489_v53 }
 0x357   : > { %v2073_v5 = vpop.f32.mrb[39].mxu0  ;;  %3492 = vmatpush3.bf16.msra.mxu1 %v3489_v53  ;;  %3371 = vmatprep.mubr.msk.f32.mxu1 %vm297_vm0, %v3999_v12 }
 0x358   : > { %v3493_v34 = vpack.c.bf16 %v3340_v44, %v2073_v5 }
 0x35a   : > { %v3343_v11 = vpop.f32.mrb[40].mxu0  ;;  %3372 = vmatmul.mubr.msk.f32.vlgmr.msra.gmra.mrb[36].mxu1 %vm297_vm0, %v4003_v13  ;;  %3494 = vmatprep.subr.bf16.mxu1 %v3493_v34 }
 0x35b   : > { %v2083_v28 = vpop.f32.mrb[41].mxu0  ;;  %3496 = vmatpush3.bf16.msra.mxu1 %v3493_v34  ;;  %3378 = vmatprep.mubr.msk.f32.mxu1 %vm297_vm0, %v3999_v12 }
 0x35c   : > { %v3497_v30 = vpack.c.bf16 %v3343_v11, %v2083_v28 }
 0x35e   : > { %v3346_v40 = vpop.f32.mrb[42].mxu0  ;;  %3379 = vmatmul.mubr.msk.f32.vlgmr.msra.gmra.mrb[38].mxu1 %vm297_vm0, %v4003_v13  ;;  %3498 = vmatprep.subr.bf16.mxu1 %v3497_v30 }
 0x35f   : > { %v2093_v39 = vpop.f32.mrb[43].mxu0  ;;  %3500 = vmatpush3.bf16.msra.mxu1 %v3497_v30  ;;  %3385 = vmatprep.mubr.msk.f32.mxu1 %vm297_vm0, %v3999_v12 }
 0x360   : > { %v3501_v36 = vpack.c.bf16 %v3346_v40, %v2093_v39 }
 0x362   : > { %v3349_v61 = vpop.f32.mrb[44].mxu0  ;;  %3386 = vmatmul.mubr.msk.f32.vlgmr.msra.gmra.mrb[40].mxu1 %vm297_vm0, %v4003_v13  ;;  %3502 = vmatprep.subr.bf16.mxu1 %v3501_v36 }
 0x363   : > { %v2103_v42 = vpop.f32.mrb[45].mxu0  ;;  %3504 = vmatpush3.bf16.msra.mxu1 %v3501_v36  ;;  %3392 = vmatprep.mubr.msk.f32.mxu1 %vm297_vm0, %v3999_v12 }
 0x364   : > { %v3505_v46 = vpack.c.bf16 %v3349_v61, %v2103_v42 }
 0x366   : > { %v3352_v45 = vpop.f32.mrb[46].mxu0  ;;  %3393 = vmatmul.mubr.msk.f32.vlgmr.msra.gmra.mrb[42].mxu1 %vm297_vm0, %v4003_v13  ;;  %3506 = vmatprep.subr.bf16.mxu1 %v3505_v46 }
 0x367   : > { %v2113_v58 = vpop.f32.mrb[47].mxu0  ;;  %3508 = vmatpush3.bf16.msra.mxu1 %v3505_v46  ;;  %3399 = vmatprep.mubr.msk.f32.mxu1 %vm297_vm0, %v3999_v12 }
 0x368   : > { %v3509_v56 = vpack.c.bf16 %v3352_v45, %v2113_v58 }
 0x36a   : > { %3400 = vmatmul.mubr.msk.f32.vlgmr.msra.gmra.mrb[44].mxu1 %vm297_vm0, %v4003_v13  ;;  %3510 = vmatprep.subr.bf16.mxu1 %v3509_v56 }
 0x36b   : > { %3512 = vmatpush3.bf16.msra.mxu1 %v3509_v56  ;;  %3406 = vmatprep.mubr.msk.f32.mxu1 %vm297_vm0, %v3999_v12 }
 0x36e   : > { %3407 = vmatmul.mubr.msk.f32.vlgmr.msra.gmra.mrb[46].mxu1 %vm297_vm0, %v4003_v13 }
 0x425   : > { %v3359_v29 = vpop.f32.mrb[32].mxu1 }
 0x426   : > { %v2188_v57 = vpop.f32.mrb[33].mxu1  ;;  %v2723_v50 = vmul.f32 %v3359_v29, %v4153_v48 }
 0x427   : > { %v2722_v52 = vmul.f32 %v2188_v57, %v4155_v49 }
 0x428   : > { %v2739_v1 = vmul.f32 %v2723_v50, %v4006_v15 }
 0x429   : > { %v3366_v31 = vpop.f32.mrb[34].mxu1  ;;  %v2738_v59 = vmul.f32 %v2722_v52, %v3995_v7 }
 0x42a   : > { %v2263_v51 = vpop.f32.mrb[35].mxu1  ;;  %v2725_v12 = vmul.f32 %v3366_v31, %v4153_v48 }
 0x42b   : > { %v2724_v37 = vmul.f32 %v2263_v51, %v4155_v49 }
 0x42c   : > { %v2741_v60 = vmul.f32 %v2725_v12, %v4016_v17 }
 0x42d   : > { %v3373_v32 = vpop.f32.mrb[36].mxu1  ;;  %v2740_v10 = vmul.f32 %v2724_v37, %v4009_v16 }
 0x42e   : > { %v2338_v33 = vpop.f32.mrb[37].mxu1  ;;  %v2727_v41 = vmul.f32 %v3373_v32, %v4153_v48 }
 0x42f   : > { %v2726_v63 = vmul.f32 %v2338_v33, %v4155_v49 }
 0x430   : > { %v2743_v23 = vmul.f32 %v2727_v41, %v4026_v19 }
 0x431   : > { %v3380_v54 = vpop.f32.mrb[38].mxu1  ;;  %v2742_v14 = vmul.f32 %v2726_v63, %v4019_v18 }
 0x432   : > { %v2413_v0 = vpop.f32.mrb[39].mxu1  ;;  %v2729_v4 = vmul.f32 %v3380_v54, %v4153_v48 }
 0x433   : > { %v2728_v22 = vmul.f32 %v2413_v0, %v4155_v49 }
 0x434   : > { %v2745_v27 = vmul.f32 %v2729_v4, %v4036_v21 }
 0x435   : > { %v3387_v35 = vpop.f32.mrb[40].mxu1  ;;  %v2744_v53 = vmul.f32 %v2728_v22, %v4029_v20 }
 0x436   : > { %v2731_v13 = vmul.f32 %v3387_v35, %v4153_v48  ;;  %v2488_v55 = vpop.f32.mrb[41].mxu1 }
 0x437   : > { %v2730_v38 = vmul.f32 %v2488_v55, %v4155_v49 }
 0x438   : > { %v2747_v62 = vadd.f32 %v2739_v1, %v2731_v13 }
 0x439   : > { %v2746_v2 = vadd.f32 %v2738_v59, %v2730_v38  ;;  %v3394_v9 = vpop.f32.mrb[42].mxu1 }
 0x43a   : > { %2755 = vst.msk [vmem:[%s4398_s8 + $0x8] sm:$0xff] %vm297_vm0, %v2747_v62  ;;  %v2733_v7 = vmul.f32 %v3394_v9, %v4153_v48  ;;  %v2563_v15 = vpop.f32.mrb[43].mxu1 }
 0x43b   : > { %2754 = vst.msk [vmem:[%s4398_s8] sm:$0xff] %vm297_vm0, %v2746_v2  ;;  %v2732_v17 = vmul.f32 %v2563_v15, %v4155_v49 }
 0x43c   : > { %v2749_v3 = vadd.f32 %v2741_v60, %v2733_v7 }
 0x43d   : > { %v2748_v43 = vadd.f32 %v2740_v10, %v2732_v17  ;;  %v3401_v6 = vpop.f32.mrb[44].mxu1 }
 0x43e   : > { %2757 = vst.msk [vmem:[%s4398_s8 + $0x18] sm:$0xff] %vm297_vm0, %v2749_v3  ;;  %v2735_v16 = vmul.f32 %v3401_v6, %v4153_v48  ;;  %v2638_v8 = vpop.f32.mrb[45].mxu1 }
 0x43f   : > { %2756 = vst.msk [vmem:[%s4398_s8 + $0x10] sm:$0xff] %vm297_vm0, %v2748_v43  ;;  %v2734_v24 = vmul.f32 %v2638_v8, %v4155_v49 }
 0x440   : > { %v2751_v25 = vadd.f32 %v2743_v23, %v2735_v16 }
 0x441   : > { %v2750_v26 = vadd.f32 %v2742_v14, %v2734_v24  ;;  %v3408_v19 = vpop.f32.mrb[46].mxu1 }
 0x442   : > { %2759 = vst.msk [vmem:[%s4398_s8 + $0x28] sm:$0xff] %vm297_vm0, %v2751_v25  ;;  %v2737_v18 = vmul.f32 %v3408_v19, %v4153_v48  ;;  %v2713_v47 = vpop.f32.mrb[47].mxu1 }
 0x443   : > { %2758 = vst.msk [vmem:[%s4398_s8 + $0x20] sm:$0xff] %vm297_vm0, %v2750_v26  ;;  %v2736_v44 = vmul.f32 %v2713_v47, %v4155_v49 }
 0x444   : > { %v2753_v5 = vadd.f32 %v2745_v27, %v2737_v18 }
 0x445   : > { %v2752_v21 = vadd.f32 %v2744_v53, %v2736_v44 }
 0x446   : > { %2761 = vst.msk [vmem:[%s4398_s8 + $0x38] sm:$0xff] %vm297_vm0, %v2753_v5 }
 0x447   : > { %2760 = vst.msk [vmem:[%s4398_s8 + $0x30] sm:$0xff] %vm297_vm0, %v2752_v21 }
 0x448   : > { %3698 = shalt.err (!%p3695_p10)
}
 0x449   : > { %s3699_s28 = scalar_lea.hbm %s4431_s27, 1024  ;;  %s3703_s23 = scalar_lea.hbm %s4486_s3, 2048 }
 0x44a   : > { %p3700_p8 = scmp.ne.s32.totalorder %s4431_s27, %s3699_s28  ;;  %p3704_p12 = scmp.lt.u32.totalorder %s4431_s27, %s4486_s3 }
 0x44b   : > { %p3705_p6 = scmp.lt.u32.totalorder %s3703_s23, %s3699_s28  ;;  %p3707_p9 = scmp.lt.u32.totalorder %s3699_s28, %s4431_s27 }
 0x44c   : > { %p3701_p7 = pnand %p3700_p8, %p4508_p1 }
 0x44d   : > { %p3706_p0 = por %p3705_p6, %p3704_p12 }
 0x44e   : > { %p3702_p3 = pneg %p3701_p7 }
 0x44f   : > { %p3708_p11 = por %p3707_p9, %p3706_p0 }
 0x451   : > { %p3709_p13 = pnand %p3708_p11, %p3702_p3 }
 0x453   : > { %3712 = shalt.err (!%p3709_p13)
}
 0x454   : > { %s3765_s21 = smov 128   ;;  %s3766_s5 = smov 8  }
 0x455   : > { %3521 = dma.vmem_to_hbm [thread:$0]  (%p4508_p1), %s4433_s17, 1024, %s4431_s27, %s4441_s24, %s3765_s21, %s3765_s21, %s3766_s5  }
 0x456 PF: > { %s2792_s8 = sand.u32 1, %s3743_s12   ;;  %p4509_p4 = scmp.ne.s32.totalorder %s4494_s26, 0 }
 0x457   : > { %p4510_p2 = scmp.ge.s32.totalorder %s3755_s15, 2  ;;  %s2793_s10 = scalar_lea.sflag [#allocation4], %s2792_s8 }
 0x459   : > { %p3535_p5 = pnand %p4510_p2, %p4509_p4 }
 0x45b   : > { %3738 = dma.done.wait (!%p3535_p5), %s2793_s10, 1024  }
 0x45c   : > { %3740 = vsyncadd (!%p3535_p5), %s2793_s10, 4294966272  ;;  %p17_p10 = scmp.ge.s32.totalorder %s3808_s16, 4   ;;  %s4511_s12 = smov %s3747_s13 }
 0x45d   : > { %s4512_s13 = smov %s3751_s14  ;;  %s4513_s14 = smov %s3817_s19 }
 0x45e   : > { %s4514_s15 = smov %s3808_s16  ;;  %19 = sbr.rel (!%p17_p10) target bundleno = 6 (0x6), region = 93 }
 0x465   :  { %2798 = vsyncpa [#allocation3], 1 }
 0x466   :  { %2800 = vsyncpa [#allocation3 + $0x1], 1 }
 0x467   :  { %2801 = vsyncpa [#allocation6], 1 }
 0x468   :  { %2803 = vsyncpa [#allocation6 + $0x1], 1 }
 0x469   :  { %2804 = vsyncpa [#allocation4], 1 }
 0x46a   :  { %2806 = vsyncpa [#allocation4 + $0x1], 1 }

</bundles_post_ra>
